<compile_context>
chip_gen: v7x
topology: tpu7x:2x2x1
jax: 0.10.0
libtpu: 0.0.40
codegen_flags: <defaults>
</compile_context>

<pallas_src>
import functools
import math

import jax
import jax.numpy as jnp
import numpy as np
from jax import lax
from jax.experimental import pallas as pl
from jax.experimental.pallas import tpu as pltpu


# -----------------------------------------------------------------------------
# Fused kernel: one grid step = one batch element, everything in VMEM.
# -----------------------------------------------------------------------------
def _muse_kernel(xq_ref, xk_ref, xv_ref,
                 wq_ref, bq_ref, wk_ref, bk_ref, wv_ref, bv_ref,
                 wo_ref, bo_ref, wc_ref, bc_ref,
                 o_ref, *, h, d_k, d_v, scale):
    f32 = jnp.float32
    xq = xq_ref[0]                                    # (nq, d_model)
    xk = xk_ref[0]                                    # (nk, d_model)
    xv = xv_ref[0]                                    # (nk, d_model)

    # --- projections: canonical [M,K]@[K,N], f32 accumulation ---------------
    q = jnp.dot(xq, wq_ref[...], preferred_element_type=f32) + bq_ref[...]
    k = jnp.dot(xk, wk_ref[...], preferred_element_type=f32) + bk_ref[...]
    v = jnp.dot(xv, wv_ref[...], preferred_element_type=f32) + bv_ref[...]
    q = q * scale            # fold 1/sqrt(d_k) into q (cheaper than scaling s)

    # --- per-head attention (static head loop, lane-slice head select) ------
    heads = []
    for hh in range(h):
        qh = q[:, hh * d_k:(hh + 1) * d_k]            # (nq, d_k)
        kh = k[:, hh * d_k:(hh + 1) * d_k]            # (nk, d_k)
        vh = v[:, hh * d_v:(hh + 1) * d_v]            # (nk, d_v)
        s = lax.dot_general(qh, kh, (((1,), (1,)), ((), ())),
                            preferred_element_type=f32)          # (nq, nk)
        m = jnp.max(s, axis=-1, keepdims=True)
        pr = jnp.exp(s - m)
        l = jnp.sum(pr, axis=-1, keepdims=True)
        oh = jnp.dot(pr, vh, preferred_element_type=f32)          # (nq, d_v)
        # approx=True (EUP) is the production choice; exact here to hold the
        # 1e-4 parity tolerance against the f32 reference.
        heads.append(oh * pl.reciprocal(l, approx=False))
    att = jnp.concatenate(heads, axis=1)              # (nq, h*d_v)

    out = jnp.dot(att, wo_ref[...], preferred_element_type=f32) + bo_ref[...]

    # --- fused conv branch in (L, C) layout, ONE stacked-K matmul -----------
    # Output is produced directly in (L, d_model) order (no transposes) and the
    # residual add happens in-kernel.  Zero "same" padding is realized by
    # rolling through an 8-row zero halo: wrapped rows always land in zeros.
    L, C_in = v.shape
    Lh = L + 8
    vhalo = jnp.concatenate([v, jnp.zeros((8, C_in), f32)], axis=0)   # (Lh, C_in)
    parts = []
    for t in range(5):                                # tap t -> input offset t-2
        d = t - 2
        parts.append(vhalo if d == 0 else pltpu.roll(vhalo, (-d) % Lh, 0))
    xstk = jnp.concatenate(parts, axis=1)             # (Lh, 5*C_in)
    out2 = jnp.dot(xstk, wc_ref[...], preferred_element_type=f32) + bc_ref[...]

    o_ref[0] = (out + out2[:L, :]).astype(o_ref.dtype)


# -----------------------------------------------------------------------------
# Fold depthwise * pointwise * dy_paras of conv1/conv3/conv5 into one dense
# 5-tap conv:  W[t][o, c] is applied at input offset (t - 2).
# -----------------------------------------------------------------------------
def build_fused_conv_weights(pw1, pwb1, dw3, dwb3, pw3, pwb3,
                             dw5, dwb5, pw5, pwb5, dy):
    taps = []
    for t in range(5):                                # offset d = t - 2
        w = dy[2] * pw5 * dw5[:, t][None, :]
        if 1 <= t <= 3:
            w = w + dy[1] * pw3 * dw3[:, t - 1][None, :]
        if t == 2:
            w = w + dy[0] * pw1
        taps.append(w)
    w_stack = jnp.stack(taps, axis=0)                 # (5, C_out, C_in)
    b_eff = (dy[0] * pwb1
             + dy[1] * (pwb3 + pw3 @ dwb3)
             + dy[2] * (pwb5 + pw5 @ dwb5))           # (C_out,)
    return w_stack, b_eff


# -----------------------------------------------------------------------------
# MUSEAttention forward (single fused Pallas call)
# -----------------------------------------------------------------------------
def muse_attention_forward(queries, keys, values, p):
    b_s, nq, d_model = queries.shape
    nk = keys.shape[1]
    h, d_k, d_v = p["h"], p["d_k"], p["d_v"]
    # The module's final `out + out2` requires nq == nk (self-attention-like).
    assert nq == nk, "residual add of the conv branch requires nq == nk"

    # One-time weight prep (tiny): transpose Linears to (K, N), fold the conv
    # branch into a single (5*C_in, d_model) weight.
    wq_t = p["wq"].T                                  # (d_model, h*d_k)
    wk_t = p["wk"].T                                  # (d_model, h*d_k)
    wv_t = p["wv"].T                                  # (d_model, h*d_v)
    wo_t = p["wo"].T                                  # (h*d_v, d_model)
    w_stack, b_eff = build_fused_conv_weights(
        p["pw1"], p["pwb1"], p["dw3"], p["dwb3"], p["pw3"], p["pwb3"],
        p["dw5"], p["dwb5"], p["pw5"], p["pwb5"], p["dy"])
    # (5, C_out, C_in) -> (5*C_in, C_out); row index = tap*C_in + c.
    w_conv = jnp.transpose(w_stack, (0, 2, 1)).reshape(5 * h * d_v, d_model)

    kernel = functools.partial(_muse_kernel, h=h, d_k=d_k, d_v=d_v,
                               scale=1.0 / math.sqrt(d_k))

    def wspec(shape):                                 # VMEM-resident weights
        return pl.BlockSpec(shape, lambda b: (0, 0))

    return pl.pallas_call(
        kernel,
        out_shape=jax.ShapeDtypeStruct((b_s, nq, d_model), queries.dtype),
        grid_spec=pltpu.PrefetchScalarGridSpec(
            num_scalar_prefetch=0,
            grid=(b_s,),
            in_specs=[
                pl.BlockSpec((1, nq, d_model), lambda b: (b, 0, 0)),
                pl.BlockSpec((1, nk, d_model), lambda b: (b, 0, 0)),
                pl.BlockSpec((1, nk, d_model), lambda b: (b, 0, 0)),
                wspec((d_model, h * d_k)), wspec((1, h * d_k)),
                wspec((d_model, h * d_k)), wspec((1, h * d_k)),
                wspec((d_model, h * d_v)), wspec((1, h * d_v)),
                wspec((h * d_v, d_model)), wspec((1, d_model)),
                wspec((5 * h * d_v, d_model)), wspec((1, d_model)),
            ],
            out_specs=pl.BlockSpec((1, nq, d_model), lambda b: (b, 0, 0)),
        ),
        compiler_params=pltpu.CompilerParams(dimension_semantics=("parallel",)),
    )(queries, keys, values,
      wq_t, p["bq"].reshape(1, -1),
      wk_t, p["bk"].reshape(1, -1),
      wv_t, p["bv"].reshape(1, -1),
      wo_t, p["bo"].reshape(1, -1),
      w_conv, b_eff.reshape(1, -1))


# -----------------------------------------------------------------------------
# Pure-JAX reference mirroring the PyTorch module (dropout = identity)
# -----------------------------------------------------------------------------
def _reference(queries, keys, values, p):
    b_s, nq, d_model = queries.shape
    nk = keys.shape[1]
    h, d_k, d_v = p["h"], p["d_k"], p["d_v"]

    def lin(x, w, b):
        return jnp.einsum("...i,oi->...o", x, w) + b

    q = lin(queries, p["wq"], p["bq"]).reshape(b_s, nq, h, d_k).transpose(0, 2, 1, 3)
    k = lin(keys, p["wk"], p["bk"]).reshape(b_s, nk, h, d_k).transpose(0, 2, 3, 1)
    v = lin(values, p["wv"], p["bv"]).reshape(b_s, nk, h, d_v).transpose(0, 2, 1, 3)
    att = jnp.einsum("bhqd,bhdk->bhqk", q, k) / np.sqrt(d_k)
    att = jax.nn.softmax(att, axis=-1)
    out = jnp.einsum("bhqk,bhkd->bhqd", att, v).transpose(0, 2, 1, 3) \
        .reshape(b_s, nq, h * d_v)
    out = lin(out, p["wo"], p["bo"])

    v2 = v.transpose(0, 1, 3, 2).reshape(b_s, h * d_v, nk)

    def dpconv(x, dw_w, dw_b, pw_w, pw_b, kk):
        if kk == 1:
            d = x
        else:
            pad = kk // 2
            xp = jnp.pad(x, ((0, 0), (0, 0), (pad, pad)))
            d = dw_b[None, :, None] + sum(
                dw_w[None, :, j, None] * xp[:, :, j:j + nk] for j in range(kk))
        return jnp.einsum("oc,bcl->bol", pw_w, d) + pw_b[None, :, None]

    out2 = (p["dy"][0] * dpconv(v2, None, None, p["pw1"], p["pwb1"], 1)
            + p["dy"][1] * dpconv(v2, p["dw3"], p["dwb3"], p["pw3"], p["pwb3"], 3)
            + p["dy"][2] * dpconv(v2, p["dw5"], p["dwb5"], p["pw5"], p["pwb5"], 5))
    out2 = out2.transpose(0, 2, 1)
    return out + out2


if __name__ == "__main__":
    jax.config.update("jax_default_matmul_precision", "highest")

    b_s, seq, d_model, d_k, d_v, h = 2, 16, 32, 8, 8, 4

    key = jax.random.PRNGKey(0)
    ks = jax.random.split(key, 20)

    def nrm(kk, shape, s=0.1):
        return jax.random.normal(kk, shape, jnp.float32) * s

    x = jax.random.normal(ks[0], (b_s, seq, d_model), jnp.float32)
    params = dict(
        h=h, d_k=d_k, d_v=d_v,
        wq=nrm(ks[1], (h * d_k, d_model)), bq=nrm(ks[2], (h * d_k,)),
        wk=nrm(ks[3], (h * d_k, d_model)), bk=nrm(ks[4], (h * d_k,)),
        wv=nrm(ks[5], (h * d_v, d_model)), bv=nrm(ks[6], (h * d_v,)),
        wo=nrm(ks[7], (d_model, h * d_v)), bo=nrm(ks[8], (d_model,)),
        pw1=nrm(ks[9], (d_model, h * d_v)), pwb1=nrm(ks[10], (d_model,)),
        dw3=nrm(ks[11], (h * d_v, 3)), dwb3=nrm(ks[12], (h * d_v,)),
        pw3=nrm(ks[13], (d_model, h * d_v)), pwb3=nrm(ks[14], (d_model,)),
        dw5=nrm(ks[15], (h * d_v, 5)), dwb5=nrm(ks[16], (h * d_v,)),
        pw5=nrm(ks[17], (d_model, h * d_v)), pwb5=nrm(ks[18], (d_model,)),
        dy=jax.random.uniform(ks[19], (3,), jnp.float32, 0.5, 1.5),
    )

    out = muse_attention_forward(x, x, x, params)
    out = jax.block_until_ready(out)

    ref = _reference(x, x, x, params)
    assert out.shape == (b_s, seq, d_model), out.shape
    np.testing.assert_allclose(np.asarray(out), np.asarray(ref),
                               rtol=1e-4, atol=1e-4)
    print("KERNEL_OK")
</pallas_src>

<mosaic_0001>
module attributes {stable_mosaic.version = 11 : i64} {
  func.func @_muse_kernel(%arg0: i32, %arg1: memref<1x16x32xf32, #tpu.memory_space<vmem>>, %arg2: memref<1x16x32xf32, #tpu.memory_space<vmem>>, %arg3: memref<1x16x32xf32, #tpu.memory_space<vmem>>, %arg4: memref<32x32xf32, #tpu.memory_space<vmem>>, %arg5: memref<1x32xf32, #tpu.memory_space<vmem>>, %arg6: memref<32x32xf32, #tpu.memory_space<vmem>>, %arg7: memref<1x32xf32, #tpu.memory_space<vmem>>, %arg8: memref<32x32xf32, #tpu.memory_space<vmem>>, %arg9: memref<1x32xf32, #tpu.memory_space<vmem>>, %arg10: memref<32x32xf32, #tpu.memory_space<vmem>>, %arg11: memref<1x32xf32, #tpu.memory_space<vmem>>, %arg12: memref<160x32xf32, #tpu.memory_space<vmem>>, %arg13: memref<1x32xf32, #tpu.memory_space<vmem>>, %arg14: memref<1x16x32xf32, #tpu.memory_space<vmem>>) attributes {dimension_semantics = [#tpu.dimension_semantics<parallel>], iteration_bounds = array<i64: 2>, scalar_prefetch = 0 : i64, scratch_operands = 0 : i64, tpu.core_type = #tpu.core_type<tc>, window_params = [{transform_indices = @transform_0, window_bounds = array<i64: 1, 16, 32>}, {transform_indices = @transform_1, window_bounds = array<i64: 1, 16, 32>}, {transform_indices = @transform_2, window_bounds = array<i64: 1, 16, 32>}, {pipeline_mode = #tpu.pipeline_mode<synchronous>, transform_indices = @transform_3, window_bounds = array<i64: 32, 32>}, {pipeline_mode = #tpu.pipeline_mode<synchronous>, transform_indices = @transform_4, window_bounds = array<i64: 1, 32>}, {pipeline_mode = #tpu.pipeline_mode<synchronous>, transform_indices = @transform_5, window_bounds = array<i64: 32, 32>}, {pipeline_mode = #tpu.pipeline_mode<synchronous>, transform_indices = @transform_6, window_bounds = array<i64: 1, 32>}, {pipeline_mode = #tpu.pipeline_mode<synchronous>, transform_indices = @transform_7, window_bounds = array<i64: 32, 32>}, {pipeline_mode = #tpu.pipeline_mode<synchronous>, transform_indices = @transform_8, window_bounds = array<i64: 1, 32>}, {pipeline_mode = #tpu.pipeline_mode<synchronous>, transform_indices = @transform_9, window_bounds = array<i64: 32, 32>}, {pipeline_mode = #tpu.pipeline_mode<synchronous>, transform_indices = @transform_10, window_bounds = array<i64: 1, 32>}, {pipeline_mode = #tpu.pipeline_mode<synchronous>, transform_indices = @transform_11, window_bounds = array<i64: 160, 32>}, {pipeline_mode = #tpu.pipeline_mode<synchronous>, transform_indices = @transform_12, window_bounds = array<i64: 1, 32>}, {transform_indices = @transform_13, window_bounds = array<i64: 1, 16, 32>}]} {
    %c0 = arith.constant 0 : index
    %c0_0 = arith.constant 0 : index
    %c0_1 = arith.constant 0 : index
    %0 = vector.load %arg1[%c0, %c0_0, %c0_1] : memref<1x16x32xf32, #tpu.memory_space<vmem>>, vector<1x16x32xf32>
    %1 = vector.shape_cast %0 : vector<1x16x32xf32> to vector<16x32xf32>
    %c0_2 = arith.constant 0 : index
    %c0_3 = arith.constant 0 : index
    %c0_4 = arith.constant 0 : index
    %2 = vector.load %arg2[%c0_2, %c0_3, %c0_4] : memref<1x16x32xf32, #tpu.memory_space<vmem>>, vector<1x16x32xf32>
    %3 = vector.shape_cast %2 : vector<1x16x32xf32> to vector<16x32xf32>
    %c0_5 = arith.constant 0 : index
    %c0_6 = arith.constant 0 : index
    %c0_7 = arith.constant 0 : index
    %4 = vector.load %arg3[%c0_5, %c0_6, %c0_7] : memref<1x16x32xf32, #tpu.memory_space<vmem>>, vector<1x16x32xf32>
    %5 = vector.shape_cast %4 : vector<1x16x32xf32> to vector<16x32xf32>
    %c0_8 = arith.constant 0 : index
    %c0_9 = arith.constant 0 : index
    %6 = vector.load %arg4[%c0_8, %c0_9] : memref<32x32xf32, #tpu.memory_space<vmem>>, vector<32x32xf32>
    %cst = arith.constant dense<0.000000e+00> : vector<16x32xf32>
    %7 = tpu.matmul %1, %6, %cst {dimension_numbers = #tpu.dot_dimension_numbers<[1], [0], [0], [1], [0, 0, 1, 1], [], []>, precision = #tpu.contract_precision<fp32>} : vector<16x32xf32>, vector<32x32xf32>, vector<16x32xf32> -> vector<16x32xf32>
    %c0_10 = arith.constant 0 : index
    %c0_11 = arith.constant 0 : index
    %8 = vector.load %arg5[%c0_10, %c0_11] : memref<1x32xf32, #tpu.memory_space<vmem>>, vector<1x32xf32>
    %9 = vector.broadcast %8 : vector<1x32xf32> to vector<16x32xf32>
    %10 = arith.addf %7, %9 : vector<16x32xf32>
    %c0_12 = arith.constant 0 : index
    %c0_13 = arith.constant 0 : index
    %11 = vector.load %arg6[%c0_12, %c0_13] : memref<32x32xf32, #tpu.memory_space<vmem>>, vector<32x32xf32>
    %cst_14 = arith.constant dense<0.000000e+00> : vector<16x32xf32>
    %12 = tpu.matmul %3, %11, %cst_14 {dimension_numbers = #tpu.dot_dimension_numbers<[1], [0], [0], [1], [0, 0, 1, 1], [], []>, precision = #tpu.contract_precision<fp32>} : vector<16x32xf32>, vector<32x32xf32>, vector<16x32xf32> -> vector<16x32xf32>
    %c0_15 = arith.constant 0 : index
    %c0_16 = arith.constant 0 : index
    %13 = vector.load %arg7[%c0_15, %c0_16] : memref<1x32xf32, #tpu.memory_space<vmem>>, vector<1x32xf32>
    %14 = vector.broadcast %13 : vector<1x32xf32> to vector<16x32xf32>
    %15 = arith.addf %12, %14 : vector<16x32xf32>
    %c0_17 = arith.constant 0 : index
    %c0_18 = arith.constant 0 : index
    %16 = vector.load %arg8[%c0_17, %c0_18] : memref<32x32xf32, #tpu.memory_space<vmem>>, vector<32x32xf32>
    %cst_19 = arith.constant dense<0.000000e+00> : vector<16x32xf32>
    %17 = tpu.matmul %5, %16, %cst_19 {dimension_numbers = #tpu.dot_dimension_numbers<[1], [0], [0], [1], [0, 0, 1, 1], [], []>, precision = #tpu.contract_precision<fp32>} : vector<16x32xf32>, vector<32x32xf32>, vector<16x32xf32> -> vector<16x32xf32>
    %c0_20 = arith.constant 0 : index
    %c0_21 = arith.constant 0 : index
    %18 = vector.load %arg9[%c0_20, %c0_21] : memref<1x32xf32, #tpu.memory_space<vmem>>, vector<1x32xf32>
    %19 = vector.broadcast %18 : vector<1x32xf32> to vector<16x32xf32>
    %20 = arith.addf %17, %19 : vector<16x32xf32>
    %cst_22 = arith.constant 0.353553385 : f32
    %21 = vector.broadcast %cst_22 : f32 to vector<16x32xf32>
    %22 = arith.mulf %10, %21 : vector<16x32xf32>
    %23 = vector.extract_strided_slice %22 {offsets = [0, 0], sizes = [16, 8], strides = [1, 1]} : vector<16x32xf32> to vector<16x8xf32>
    %24 = vector.extract_strided_slice %15 {offsets = [0, 0], sizes = [16, 8], strides = [1, 1]} : vector<16x32xf32> to vector<16x8xf32>
    %25 = vector.extract_strided_slice %20 {offsets = [0, 0], sizes = [16, 8], strides = [1, 1]} : vector<16x32xf32> to vector<16x8xf32>
    %cst_23 = arith.constant dense<0.000000e+00> : vector<16x16xf32>
    %26 = tpu.matmul %23, %24, %cst_23 {dimension_numbers = #tpu.dot_dimension_numbers<[1], [1], [0], [0], [0, 0, 1, 0], [], []>, precision = #tpu.contract_precision<fp32>} : vector<16x8xf32>, vector<16x8xf32>, vector<16x16xf32> -> vector<16x16xf32>
    %cst_24 = arith.constant dense<0xFF800000> : vector<16xf32>
    %27 = vector.multi_reduction <maximumf>, %26, %cst_24 [1] : vector<16x16xf32> to vector<16xf32>
    %28 = vector.shape_cast %27 : vector<16xf32> to vector<16x1xf32>
    %29 = vector.broadcast %28 : vector<16x1xf32> to vector<16x16xf32>
    %30 = arith.subf %26, %29 : vector<16x16xf32>
    %31 = math.exp %30 : vector<16x16xf32>
    %cst_25 = arith.constant dense<0.000000e+00> : vector<16xf32>
    %32 = vector.multi_reduction <add>, %31, %cst_25 [1] : vector<16x16xf32> to vector<16xf32>
    %33 = vector.shape_cast %32 : vector<16xf32> to vector<16x1xf32>
    %cst_26 = arith.constant dense<0.000000e+00> : vector<16x8xf32>
    %34 = tpu.matmul %31, %25, %cst_26 {dimension_numbers = #tpu.dot_dimension_numbers<[1], [0], [0], [1], [0, 0, 1, 1], [], []>, precision = #tpu.contract_precision<fp32>} : vector<16x16xf32>, vector<16x8xf32>, vector<16x8xf32> -> vector<16x8xf32>
    %35 = tpu.reciprocal %33 : vector<16x1xf32> -> vector<16x1xf32>
    %36 = vector.broadcast %35 : vector<16x1xf32> to vector<16x8xf32>
    %37 = arith.mulf %34, %36 : vector<16x8xf32>
    %38 = vector.extract_strided_slice %22 {offsets = [0, 8], sizes = [16, 8], strides = [1, 1]} : vector<16x32xf32> to vector<16x8xf32>
    %39 = vector.extract_strided_slice %15 {offsets = [0, 8], sizes = [16, 8], strides = [1, 1]} : vector<16x32xf32> to vector<16x8xf32>
    %40 = vector.extract_strided_slice %20 {offsets = [0, 8], sizes = [16, 8], strides = [1, 1]} : vector<16x32xf32> to vector<16x8xf32>
    %cst_27 = arith.constant dense<0.000000e+00> : vector<16x16xf32>
    %41 = tpu.matmul %38, %39, %cst_27 {dimension_numbers = #tpu.dot_dimension_numbers<[1], [1], [0], [0], [0, 0, 1, 0], [], []>, precision = #tpu.contract_precision<fp32>} : vector<16x8xf32>, vector<16x8xf32>, vector<16x16xf32> -> vector<16x16xf32>
    %cst_28 = arith.constant dense<0xFF800000> : vector<16xf32>
    %42 = vector.multi_reduction <maximumf>, %41, %cst_28 [1] : vector<16x16xf32> to vector<16xf32>
    %43 = vector.shape_cast %42 : vector<16xf32> to vector<16x1xf32>
    %44 = vector.broadcast %43 : vector<16x1xf32> to vector<16x16xf32>
    %45 = arith.subf %41, %44 : vector<16x16xf32>
    %46 = math.exp %45 : vector<16x16xf32>
    %cst_29 = arith.constant dense<0.000000e+00> : vector<16xf32>
    %47 = vector.multi_reduction <add>, %46, %cst_29 [1] : vector<16x16xf32> to vector<16xf32>
    %48 = vector.shape_cast %47 : vector<16xf32> to vector<16x1xf32>
    %cst_30 = arith.constant dense<0.000000e+00> : vector<16x8xf32>
    %49 = tpu.matmul %46, %40, %cst_30 {dimension_numbers = #tpu.dot_dimension_numbers<[1], [0], [0], [1], [0, 0, 1, 1], [], []>, precision = #tpu.contract_precision<fp32>} : vector<16x16xf32>, vector<16x8xf32>, vector<16x8xf32> -> vector<16x8xf32>
    %50 = tpu.reciprocal %48 : vector<16x1xf32> -> vector<16x1xf32>
    %51 = vector.broadcast %50 : vector<16x1xf32> to vector<16x8xf32>
    %52 = arith.mulf %49, %51 : vector<16x8xf32>
    %53 = vector.extract_strided_slice %22 {offsets = [0, 16], sizes = [16, 8], strides = [1, 1]} : vector<16x32xf32> to vector<16x8xf32>
    %54 = vector.extract_strided_slice %15 {offsets = [0, 16], sizes = [16, 8], strides = [1, 1]} : vector<16x32xf32> to vector<16x8xf32>
    %55 = vector.extract_strided_slice %20 {offsets = [0, 16], sizes = [16, 8], strides = [1, 1]} : vector<16x32xf32> to vector<16x8xf32>
    %cst_31 = arith.constant dense<0.000000e+00> : vector<16x16xf32>
    %56 = tpu.matmul %53, %54, %cst_31 {dimension_numbers = #tpu.dot_dimension_numbers<[1], [1], [0], [0], [0, 0, 1, 0], [], []>, precision = #tpu.contract_precision<fp32>} : vector<16x8xf32>, vector<16x8xf32>, vector<16x16xf32> -> vector<16x16xf32>
    %cst_32 = arith.constant dense<0xFF800000> : vector<16xf32>
    %57 = vector.multi_reduction <maximumf>, %56, %cst_32 [1] : vector<16x16xf32> to vector<16xf32>
    %58 = vector.shape_cast %57 : vector<16xf32> to vector<16x1xf32>
    %59 = vector.broadcast %58 : vector<16x1xf32> to vector<16x16xf32>
    %60 = arith.subf %56, %59 : vector<16x16xf32>
    %61 = math.exp %60 : vector<16x16xf32>
    %cst_33 = arith.constant dense<0.000000e+00> : vector<16xf32>
    %62 = vector.multi_reduction <add>, %61, %cst_33 [1] : vector<16x16xf32> to vector<16xf32>
    %63 = vector.shape_cast %62 : vector<16xf32> to vector<16x1xf32>
    %cst_34 = arith.constant dense<0.000000e+00> : vector<16x8xf32>
    %64 = tpu.matmul %61, %55, %cst_34 {dimension_numbers = #tpu.dot_dimension_numbers<[1], [0], [0], [1], [0, 0, 1, 1], [], []>, precision = #tpu.contract_precision<fp32>} : vector<16x16xf32>, vector<16x8xf32>, vector<16x8xf32> -> vector<16x8xf32>
    %65 = tpu.reciprocal %63 : vector<16x1xf32> -> vector<16x1xf32>
    %66 = vector.broadcast %65 : vector<16x1xf32> to vector<16x8xf32>
    %67 = arith.mulf %64, %66 : vector<16x8xf32>
    %68 = vector.extract_strided_slice %22 {offsets = [0, 24], sizes = [16, 8], strides = [1, 1]} : vector<16x32xf32> to vector<16x8xf32>
    %69 = vector.extract_strided_slice %15 {offsets = [0, 24], sizes = [16, 8], strides = [1, 1]} : vector<16x32xf32> to vector<16x8xf32>
    %70 = vector.extract_strided_slice %20 {offsets = [0, 24], sizes = [16, 8], strides = [1, 1]} : vector<16x32xf32> to vector<16x8xf32>
    %cst_35 = arith.constant dense<0.000000e+00> : vector<16x16xf32>
    %71 = tpu.matmul %68, %69, %cst_35 {dimension_numbers = #tpu.dot_dimension_numbers<[1], [1], [0], [0], [0, 0, 1, 0], [], []>, precision = #tpu.contract_precision<fp32>} : vector<16x8xf32>, vector<16x8xf32>, vector<16x16xf32> -> vector<16x16xf32>
    %cst_36 = arith.constant dense<0xFF800000> : vector<16xf32>
    %72 = vector.multi_reduction <maximumf>, %71, %cst_36 [1] : vector<16x16xf32> to vector<16xf32>
    %73 = vector.shape_cast %72 : vector<16xf32> to vector<16x1xf32>
    %74 = vector.broadcast %73 : vector<16x1xf32> to vector<16x16xf32>
    %75 = arith.subf %71, %74 : vector<16x16xf32>
    %76 = math.exp %75 : vector<16x16xf32>
    %cst_37 = arith.constant dense<0.000000e+00> : vector<16xf32>
    %77 = vector.multi_reduction <add>, %76, %cst_37 [1] : vector<16x16xf32> to vector<16xf32>
    %78 = vector.shape_cast %77 : vector<16xf32> to vector<16x1xf32>
    %cst_38 = arith.constant dense<0.000000e+00> : vector<16x8xf32>
    %79 = tpu.matmul %76, %70, %cst_38 {dimension_numbers = #tpu.dot_dimension_numbers<[1], [0], [0], [1], [0, 0, 1, 1], [], []>, precision = #tpu.contract_precision<fp32>} : vector<16x16xf32>, vector<16x8xf32>, vector<16x8xf32> -> vector<16x8xf32>
    %80 = tpu.reciprocal %78 : vector<16x1xf32> -> vector<16x1xf32>
    %81 = vector.broadcast %80 : vector<16x1xf32> to vector<16x8xf32>
    %82 = arith.mulf %79, %81 : vector<16x8xf32>
    %83 = tpu.concatenate %37, %52, %67, %82 in 1 : vector<16x8xf32>, vector<16x8xf32>, vector<16x8xf32>, vector<16x8xf32> -> vector<16x32xf32>
    %c0_39 = arith.constant 0 : index
    %c0_40 = arith.constant 0 : index
    %84 = vector.load %arg10[%c0_39, %c0_40] : memref<32x32xf32, #tpu.memory_space<vmem>>, vector<32x32xf32>
    %cst_41 = arith.constant dense<0.000000e+00> : vector<16x32xf32>
    %85 = tpu.matmul %83, %84, %cst_41 {dimension_numbers = #tpu.dot_dimension_numbers<[1], [0], [0], [1], [0, 0, 1, 1], [], []>, precision = #tpu.contract_precision<fp32>} : vector<16x32xf32>, vector<32x32xf32>, vector<16x32xf32> -> vector<16x32xf32>
    %c0_42 = arith.constant 0 : index
    %c0_43 = arith.constant 0 : index
    %86 = vector.load %arg11[%c0_42, %c0_43] : memref<1x32xf32, #tpu.memory_space<vmem>>, vector<1x32xf32>
    %87 = vector.broadcast %86 : vector<1x32xf32> to vector<16x32xf32>
    %88 = arith.addf %85, %87 : vector<16x32xf32>
    %cst_44 = arith.constant 0.000000e+00 : f32
    %89 = vector.broadcast %cst_44 : f32 to vector<8x32xf32>
    %90 = tpu.concatenate %20, %89 in 0 : vector<16x32xf32>, vector<8x32xf32> -> vector<24x32xf32>
    %c2_i32 = arith.constant 2 : i32
    %91 = tpu.dynamic_rotate %90 by %c2_i32 dim 0 : vector<24x32xf32>, i32 -> vector<24x32xf32>
    %c1_i32 = arith.constant 1 : i32
    %92 = tpu.dynamic_rotate %90 by %c1_i32 dim 0 : vector<24x32xf32>, i32 -> vector<24x32xf32>
    %c23_i32 = arith.constant 23 : i32
    %93 = tpu.dynamic_rotate %90 by %c23_i32 dim 0 : vector<24x32xf32>, i32 -> vector<24x32xf32>
    %c22_i32 = arith.constant 22 : i32
    %94 = tpu.dynamic_rotate %90 by %c22_i32 dim 0 : vector<24x32xf32>, i32 -> vector<24x32xf32>
    %95 = tpu.concatenate %91, %92, %90, %93, %94 in 1 : vector<24x32xf32>, vector<24x32xf32>, vector<24x32xf32>, vector<24x32xf32>, vector<24x32xf32> -> vector<24x160xf32>
    %c0_45 = arith.constant 0 : index
    %c0_46 = arith.constant 0 : index
    %96 = vector.load %arg12[%c0_45, %c0_46] : memref<160x32xf32, #tpu.memory_space<vmem>>, vector<160x32xf32>
    %cst_47 = arith.constant dense<0.000000e+00> : vector<24x32xf32>
    %97 = tpu.matmul %95, %96, %cst_47 {dimension_numbers = #tpu.dot_dimension_numbers<[1], [0], [0], [1], [0, 0, 1, 1], [], []>, precision = #tpu.contract_precision<fp32>} : vector<24x160xf32>, vector<160x32xf32>, vector<24x32xf32> -> vector<24x32xf32>
    %c0_48 = arith.constant 0 : index
    %c0_49 = arith.constant 0 : index
    %98 = vector.load %arg13[%c0_48, %c0_49] : memref<1x32xf32, #tpu.memory_space<vmem>>, vector<1x32xf32>
    %99 = vector.broadcast %98 : vector<1x32xf32> to vector<24x32xf32>
    %100 = arith.addf %97, %99 : vector<24x32xf32>
    %101 = vector.extract_strided_slice %100 {offsets = [0, 0], sizes = [16, 32], strides = [1, 1]} : vector<24x32xf32> to vector<16x32xf32>
    %102 = arith.addf %88, %101 : vector<16x32xf32>
    %c0_50 = arith.constant 0 : index
    %c0_51 = arith.constant 0 : index
    %c0_52 = arith.constant 0 : index
    %103 = vector.load %arg14[%c0_50, %c0_51, %c0_52] : memref<1x16x32xf32, #tpu.memory_space<vmem>>, vector<1x16x32xf32>
    %104 = vector.shape_cast %103 : vector<1x16x32xf32> to vector<16x32xf32>
    %105 = vector.shape_cast %102 : vector<16x32xf32> to vector<1x16x32xf32>
    tpu.vector_store %arg14[%c0_50, %c0_51, %c0_52], %105 {strides = array<i32>} : memref<1x16x32xf32, #tpu.memory_space<vmem>>, vector<1x16x32xf32>,
    return
  }
  func.func @transform_0(%arg0: i32) -> (i32, i32, i32) {
    %c0_i32 = arith.constant 0 : i32
    %c0_i32_0 = arith.constant 0 : i32
    %c0_i32_1 = arith.constant 0 : i32
    return %arg0, %c0_i32, %c0_i32_0 : i32, i32, i32
  }
  func.func @transform_1(%arg0: i32) -> (i32, i32, i32) {
    %c0_i32 = arith.constant 0 : i32
    %c0_i32_0 = arith.constant 0 : i32
    %c0_i32_1 = arith.constant 0 : i32
    return %arg0, %c0_i32, %c0_i32_0 : i32, i32, i32
  }
  func.func @transform_2(%arg0: i32) -> (i32, i32, i32) {
    %c0_i32 = arith.constant 0 : i32
    %c0_i32_0 = arith.constant 0 : i32
    %c0_i32_1 = arith.constant 0 : i32
    return %arg0, %c0_i32, %c0_i32_0 : i32, i32, i32
  }
  func.func @transform_3(%arg0: i32) -> (i32, i32) {
    %c0_i32 = arith.constant 0 : i32
    %c0_i32_0 = arith.constant 0 : i32
    %c0_i32_1 = arith.constant 0 : i32
    return %c0_i32, %c0_i32_0 : i32, i32
  }
  func.func @transform_4(%arg0: i32) -> (i32, i32) {
    %c0_i32 = arith.constant 0 : i32
    %c0_i32_0 = arith.constant 0 : i32
    %c0_i32_1 = arith.constant 0 : i32
    return %c0_i32, %c0_i32_0 : i32, i32
  }
  func.func @transform_5(%arg0: i32) -> (i32, i32) {
    %c0_i32 = arith.constant 0 : i32
    %c0_i32_0 = arith.constant 0 : i32
    %c0_i32_1 = arith.constant 0 : i32
    return %c0_i32, %c0_i32_0 : i32, i32
  }
  func.func @transform_6(%arg0: i32) -> (i32, i32) {
    %c0_i32 = arith.constant 0 : i32
    %c0_i32_0 = arith.constant 0 : i32
    %c0_i32_1 = arith.constant 0 : i32
    return %c0_i32, %c0_i32_0 : i32, i32
  }
  func.func @transform_7(%arg0: i32) -> (i32, i32) {
    %c0_i32 = arith.constant 0 : i32
    %c0_i32_0 = arith.constant 0 : i32
    %c0_i32_1 = arith.constant 0 : i32
    return %c0_i32, %c0_i32_0 : i32, i32
  }
  func.func @transform_8(%arg0: i32) -> (i32, i32) {
    %c0_i32 = arith.constant 0 : i32
    %c0_i32_0 = arith.constant 0 : i32
    %c0_i32_1 = arith.constant 0 : i32
    return %c0_i32, %c0_i32_0 : i32, i32
  }
  func.func @transform_9(%arg0: i32) -> (i32, i32) {
    %c0_i32 = arith.constant 0 : i32
    %c0_i32_0 = arith.constant 0 : i32
    %c0_i32_1 = arith.constant 0 : i32
    return %c0_i32, %c0_i32_0 : i32, i32
  }
  func.func @transform_10(%arg0: i32) -> (i32, i32) {
    %c0_i32 = arith.constant 0 : i32
    %c0_i32_0 = arith.constant 0 : i32
    %c0_i32_1 = arith.constant 0 : i32
    return %c0_i32, %c0_i32_0 : i32, i32
  }
  func.func @transform_11(%arg0: i32) -> (i32, i32) {
    %c0_i32 = arith.constant 0 : i32
    %c0_i32_0 = arith.constant 0 : i32
    %c0_i32_1 = arith.constant 0 : i32
    return %c0_i32, %c0_i32_0 : i32, i32
  }
  func.func @transform_12(%arg0: i32) -> (i32, i32) {
    %c0_i32 = arith.constant 0 : i32
    %c0_i32_0 = arith.constant 0 : i32
    %c0_i32_1 = arith.constant 0 : i32
    return %c0_i32, %c0_i32_0 : i32, i32
  }
  func.func @transform_13(%arg0: i32) -> (i32, i32, i32) {
    %c0_i32 = arith.constant 0 : i32
    %c0_i32_0 = arith.constant 0 : i32
    %c0_i32_1 = arith.constant 0 : i32
    return %arg0, %c0_i32, %c0_i32_0 : i32, i32, i32
  }
}

</mosaic_0001>

<bundles_post_ra>
// kernel: tpu_custom_call.1
= control target key start
LH: loop header
LB: loop body
LE: loop exit
PB: predicated region body
PF: predicated region fallthrough
CT: control target
= control target key end

     0   :  { %s11110_s0 = inlined_call_operand.vmem [shape: f32[2,16,32], index: 0, kind: input, shape index: {}]   ;;  %s11111_s1 = inlined_call_operand.vmem [shape: f32[2,16,32], index: 1, kind: input, shape index: {}]   ;;  %s11112_s2 = inlined_call_operand.vmem [shape: f32[2,16,32], index: 2, kind: input, shape index: {}]   ;;  %s11113_s3 = inlined_call_operand.vmem [shape: f32[32,32], index: 3, kind: input, shape index: {}]   ;;  %s11114_s4 = inlined_call_operand.vmem [shape: f32[1,32], index: 4, kind: input, shape index: {}]   ;;  %s11115_s5 = inlined_call_operand.vmem [shape: f32[32,32], index: 5, kind: input, shape index: {}]   ;;  %s11116_s6 = inlined_call_operand.vmem [shape: f32[1,32], index: 6, kind: input, shape index: {}]   ;;  %s11117_s7 = inlined_call_operand.vmem [shape: f32[32,32], index: 7, kind: input, shape index: {}]   ;;  %s11118_s8 = inlined_call_operand.vmem [shape: f32[1,32], index: 8, kind: input, shape index: {}]   ;;  %s11119_s9 = inlined_call_operand.vmem [shape: f32[32,32], index: 9, kind: input, shape index: {}]   ;;  %s11120_s10 = inlined_call_operand.vmem [shape: f32[1,32], index: 10, kind: input, shape index: {}]   ;;  %s11121_s11 = inlined_call_operand.vmem [shape: f32[160,32], index: 11, kind: input, shape index: {}]   ;;  %s11122_s12 = inlined_call_operand.vmem [shape: f32[1,32], index: 12, kind: input, shape index: {}]   ;;  %s11123_s13 = inlined_call_operand.hbm [shape: f32[2,16,32], index: 13, kind: output, shape index: {}]  }
   0x1   :  { %11175 = sst [smem:[#allocation17_spill]] %s11110_s0 }
   0x2   :  { %18 = vsyncpa [#allocation3], 0 }
   0x3   :  { %20 = vsyncpa [#allocation3 + $0x1], 0  ;;  %s9835_s25 = smov 0   ;;  %s9837_s26 = smov 0  }
   0x4   :  { %s9839_s27 = smov 0   ;;  %s9841_s28 = smov 0  }
   0x5 LB: > { %11176 = sst [smem:[#allocation5_spill]] %s9746_s27  ;;  %s9856_s29 = sadd.s32 4294967295, %s9750_s28   ;;  %s9750_s28 = sphi %s9841_s28, %s11234_s28   ;;  %s9746_s27 = sphi %s9839_s27, %s11231_s27   ;;  %s9742_s26 = sphi %s9837_s26, %s11233_s26   ;;  %s9738_s25 = sphi %s9835_s25, %s11232_s25  }
   0x6   : > { %s7932_s30 = sadd.s32 4294967294, %s9750_s28   ;;  %s9860_s14 = sadd.s32 1, %s9750_s28  }
   0x7   : > { %s321_s15 = sadd.s32 1, %s9746_s27  ;;  %s318_s16 = ssub.s32 %s9750_s28, %s9860_s14 }
   0x8   : > { %p331_p0 = scmp.ne.s32.totalorder %s9746_s27, %s9742_s26  ;;  %p319_p1 = scmp.eq.s32.totalorder %s318_s16, 0 }
   0x9   : > { %p332_p2 = scmp.eq.s32.totalorder %s9856_s29, 1  ;;  %p337_p3 = scmp.ne.s32.totalorder %s9742_s26, %s9738_s25 }
   0xa   : > { %p338_p4 = scmp.eq.s32.totalorder %s7932_s30, 1  ;;  %p7935_p7 = scmp.ge.s32.totalorder %s9750_s28, 1 }
   0xb   : > { %s9871_s17 = scalar_select %p319_p1, %s9746_s27, %s321_s15  }
   0xc   : > { %p9873_p5 = por %p332_p2, %p331_p0  ;;  %p9877_p6 = por %p338_p4, %p337_p3 }
   0xd   : > { %11177 = sst [smem:[#allocation6_spill]] %s9871_s17  ;;  %p410_p8 = scmp.lt.s32.totalorder %s9750_s28, 3 }
   0xf   : > { %p411_p9 = pnand %p7935_p7, %p410_p8 }
  0x11   : > { %414 = sbr.rel (%p411_p9) target bundleno = 2560 (0xa00), region = 72 }
  0x18   : > { %v485_v0 = vld [vmem:[%s11113_s3] sm:$0xff]  ;;  %v486_v1 = vld [vmem:[%s11113_s3 + $0x8] sm:$0xff]  ;;  %v487_v2 = vld [vmem:[%s11113_s3 + $0x10] sm:$0xff]  ;;  %p464_p10 = scmp.lt.s32.totalorder %s9856_s29, 1  ;;  %vm496_vm0 = vcmask 261120   ;;  %s11180_s0 = sld [smem:[#allocation17_spill]] }
  0x19   : > { %v504_v3 = vand.u32 4294901760, %v485_v0  ;;  %v507_v4 = vand.u32 4294901760, %v486_v1  ;;  %v488_v5 = vld [vmem:[%s11113_s3 + $0x18] sm:$0xff]  ;;  %v510_v6 = vand.u32 4294901760, %v487_v2  ;;  %v1031_v7 = vld [vmem:[%s11115_s5] sm:$0xff]  ;;  %v1032_v8 = vld [vmem:[%s11115_s5 + $0x8] sm:$0xff] }
  0x1a   : > { %v513_v9 = vand.u32 4294901760, %v488_v5  ;;  %s465_s22 = scalar_select %p464_p10, %s9856_s29, 1  ;;  %v1049_v10 = vand.u32 4294901760, %v1031_v7  ;;  %v1052_v11 = vand.u32 4294901760, %v1032_v8  ;;  %v9914_v16 = vld [vmem:[%s11115_s5 + $0x10] sm:$0xff]  ;;  %v9919_v17 = vld [vmem:[%s11115_s5 + $0x18] sm:$0xff] }
  0x1b   : > { %v9903_v12 = vpack.c.bf16 %v507_v4, %v504_v3  ;;  %v9905_v13 = vsub.f32 %v485_v0, %v504_v3  ;;  %v9907_v14 = vsub.f32 %v486_v1, %v507_v4  ;;  %v9909_v15 = vsub.f32 %v487_v2, %v510_v6  ;;  %s9752_s15 = smov 120   ;;  %s11174_s24 = smov 8  }
  0x1c   : > { %v9921_v18 = vpack.c.bf16 %v513_v9, %v510_v6  ;;  %s9923_s17 = sshll.u32 %s465_s22, 4  ;;  %v9925_v19 = vsub.f32 %v1031_v7, %v1049_v10  ;;  %v9927_v20 = vsub.f32 %v1032_v8, %v1052_v11  ;;  %v9937_v24 = vsub.f32 %v488_v5, %v513_v9  ;;  %s9753_s22 = smov 112  }
  0x1d   : > { %8894 = vmatprep.subr.bf16.mxu0 %v9903_v12  ;;  %v595_v21 = vand.u32 4294901760, %v9905_v13  ;;  %v602_v22 = vand.u32 4294901760, %v9907_v14  ;;  %v609_v23 = vand.u32 4294901760, %v9909_v15  ;;  %s473_s23 = scalar_lea.vmem %s11111_s1, %s9923_s17  ;;  %v1055_v28 = vand.u32 4294901760, %v9914_v16  ;;  %s478_s27 = scalar_lea.vmem %s11112_s2, %s9923_s17 }
  0x1e   : > { %s468_s20 = scalar_lea.vmem %s11180_s0, %s9923_s17  ;;  %8896 = vmatpush3.bf16.msra.mxu0 %v9903_v12  ;;  %v8957_v27 = vpack.c.bf16 %v9927_v20, %v9925_v19  ;;  %v1058_v29 = vand.u32 4294901760, %v9919_v17  ;;  %v616_v36 = vand.u32 4294901760, %v9937_v24  ;;  %v481_v37 = vld [vmem:[%s473_s23] sm:$0xff]  ;;  %v482_v38 = vld [vmem:[%s473_s23 + $0x8] sm:$0xff]  ;;  %v9985_v52 = vpack.c.bf16 %v1052_v11, %v1049_v10  ;;  %s9754_s23 = smov 104  }
  0x1f   : > { %v479_v25 = vld [vmem:[%s468_s20] sm:$0xff]  ;;  %v480_v26 = vld [vmem:[%s468_s20 + $0x8] sm:$0xff]  ;;  %8898 = vmatprep.subr.bf16.mxu0 %v9921_v18  ;;  %v596_v31 = vsub.f32 %v9905_v13, %v595_v21  ;;  %v603_v32 = vsub.f32 %v9907_v14, %v602_v22  ;;  %v610_v41 = vsub.f32 %v9909_v15, %v609_v23  ;;  %v9966_v42 = vsub.f32 %v9914_v16, %v1055_v28  ;;  %s9756_s30 = smov 16   ;;  %s9758_s20 = smov 24  }
  0x20   : > { %v498_v30 = vsel %vm496_vm0, %v479_v25, 0  ;;  %v501_v33 = vsel %vm496_vm0, %v480_v26, 0  ;;  %8958 = vmatprep.subr.bf16.mxu1 %v8957_v27  ;;  %v617_v45 = vsub.f32 %v9937_v24, %v616_v36  ;;  %v9979_v47 = vsub.f32 %v9919_v17, %v1058_v29  ;;  %s9759_s21 = smov 64   ;;  %s9760_s17 = smov 32  }
  0x21   : > { %v9957_v34 = vand.u32 4294901760, %v498_v30  ;;  %v9959_v35 = vand.u32 4294901760, %v501_v33  ;;  %v597_v39 = vand.u32 4294901760, %v596_v31  ;;  %v604_v40 = vand.u32 4294901760, %v603_v32  ;;  %8960 = vmatpush3.bf16.msra.mxu1 %v8957_v27 }
  0x22   : > { %8900 = vmatpush3.bf16.msra.mxu0 %v9921_v18  ;;  %v1043_v48 = vsel %vm496_vm0, %v481_v37, 0  ;;  %v1046_v49 = vsel %vm496_vm0, %v482_v38, 0  ;;  %v611_v54 = vand.u32 4294901760, %v610_v41  ;;  %v618_v55 = vand.u32 4294901760, %v617_v45  ;;  %v1578_v41 = vld [vmem:[%s11117_s7 + $0x10] sm:$0xff] }
  0x23   : > { %v9970_v43 = vsub.f32 %v498_v30, %v9957_v34  ;;  %v9973_v44 = vsub.f32 %v501_v33, %v9959_v35  ;;  %v8901_v46 = vpack.c.bf16 %v604_v40, %v597_v39  ;;  %v9987_v53 = vand.u32 4294901760, %v1043_v48  ;;  %v483_v30 = vld [vmem:[%s478_s27] sm:$0xff]  ;;  %v484_v33 = vld [vmem:[%s478_s27 + $0x8] sm:$0xff]  ;;  %s461_s27 = sand.u32 1, %s9742_s26  }
  0x24   : > { %v8961_v56 = vpack.c.bf16 %v9979_v47, %v9966_v42  ;;  %v9991_v57 = vand.u32 4294901760, %v1046_v49  ;;  %v8905_v0 = vpack.c.bf16 %v618_v55, %v611_v54  ;;  %v10005_v1 = vpack.c.bf16 %v1058_v29, %v1055_v28  ;;  %v1576_v28 = vld [vmem:[%s11117_s7] sm:$0xff]  ;;  %v1577_v29 = vld [vmem:[%s11117_s7 + $0x8] sm:$0xff] }
  0x25   : > { %v574_v50 = vand.u32 4294901760, %v9970_v43  ;;  %v584_v51 = vand.u32 4294901760, %v9973_v44  ;;  %8902 = vmatprep.subr.bf16.mxu0 %v8901_v46  ;;  %v9998_v60 = vsub.f32 %v1043_v48, %v9987_v53  ;;  %v1140_v3 = vand.u32 4294901760, %v9925_v19 }
  0x26   : > { %8962 = vmatprep.subr.bf16.mxu1 %v8961_v56  ;;  %v10001_v61 = vsub.f32 %v1046_v49, %v9991_v57  ;;  %v1147_v4 = vand.u32 4294901760, %v9927_v20  ;;  %v8909_v5 = vpack.c.bf16 %v9907_v14, %v9905_v13  ;;  %v1154_v7 = vand.u32 4294901760, %v9966_v42 }
  0x27   : > { %v575_v58 = vsub.f32 %v9970_v43, %v574_v50  ;;  %v585_v59 = vsub.f32 %v9973_v44, %v584_v51  ;;  %8964 = vmatpush3.bf16.msra.mxu1 %v8961_v56  ;;  %8389 = vmatprep.mubr.f32.mxu1 %v9998_v60  ;;  %v1119_v2 = vand.u32 4294901760, %v9998_v60  ;;  %v1161_v8 = vand.u32 4294901760, %v9979_v47 }
  0x28   : > { %8966 = vmatprep.subr.bf16.mxu1 %v9985_v52  ;;  %v8973_v6 = vpack.c.bf16 %v1147_v4, %v1140_v3  ;;  %v8913_v9 = vpack.c.bf16 %v9937_v24, %v9909_v15  ;;  %v1129_v10 = vand.u32 4294901760, %v10001_v61  ;;  %v8925_v16 = vpack.c.bf16 %v602_v22, %v595_v21 }
  0x29   : > { %v576_v62 = vand.u32 4294901760, %v575_v58  ;;  %v586_v63 = vand.u32 4294901760, %v585_v59  ;;  %v8977_v11 = vpack.c.bf16 %v1161_v8, %v1154_v7  ;;  %v8929_v17 = vpack.c.bf16 %v616_v36, %v609_v23 }
  0x2a   : > { %8390 = vmatmul.mubr.f32.vlgmr.msra.gmra.mrb[0].mxu1 %v10001_v61  ;;  %v1120_v13 = vsub.f32 %v9998_v60, %v1119_v2  ;;  %v1141_v14 = vsub.f32 %v9925_v19, %v1140_v3  ;;  %v1148_v15 = vsub.f32 %v9927_v20, %v1147_v4  ;;  %v1155_v24 = vsub.f32 %v9966_v42, %v1154_v7  ;;  %v1579_v42 = vld [vmem:[%s11117_s7 + $0x18] sm:$0xff] }
  0x2b   : > { %8301 = vmatprep.mubr.f32.mxu0 %v576_v62  ;;  %8968 = vmatpush3.bf16.msra.mxu1 %v9985_v52  ;;  %v1130_v25 = vsub.f32 %v10001_v61, %v1129_v10  ;;  %v1594_v31 = vand.u32 4294901760, %v1576_v28  ;;  %v1597_v32 = vand.u32 4294901760, %v1577_v29  ;;  %v1591_v36 = vsel %vm496_vm0, %v484_v33, 0 }
  0x2c   : > { %8302 = vmatmul.mubr.f32.vlgmr.msra.gmra.mrb[0].mxu0 %v586_v63  ;;  %8970 = vmatprep.subr.bf16.mxu1 %v10005_v1  ;;  %v1121_v21 = vand.u32 4294901760, %v1120_v13  ;;  %v1142_v22 = vand.u32 4294901760, %v1141_v14  ;;  %v1149_v23 = vand.u32 4294901760, %v1148_v15  ;;  %v1156_v19 = vand.u32 4294901760, %v1155_v24 }
  0x2d   : > { %8904 = vmatpush3.bf16.msra.mxu0 %v8901_v46  ;;  %8312 = vmatprep.mubr.f32.mxu0 %v9957_v34  ;;  %v1131_v26 = vand.u32 4294901760, %v1130_v25  ;;  %v10081_v37 = vpack.c.bf16 %v1597_v32, %v1594_v31  ;;  %v10083_v38 = vand.u32 4294901760, %v1591_v36  ;;  %v1684_v39 = vsub.f32 %v1576_v28, %v1594_v31 }
  0x2e   : > { %8906 = vmatprep.subr.bf16.mxu0 %v8905_v0  ;;  %8400 = vmatprep.mubr.f32.mxu1 %v1119_v2  ;;  %v1691_v40 = vsub.f32 %v1577_v29, %v1597_v32  ;;  %v1603_v45 = vand.u32 4294901760, %v1579_v42  ;;  %vm2123_vm1 = vcmask 64512   ;;  %vm2638_vm2 = vcmask 130048  }
  0x2f   : > { %8972 = vmatpush3.bf16.msra.mxu1 %v10005_v1  ;;  %v1673_v46 = vsub.f32 %v1591_v36, %v10083_v38  ;;  %vm6361_vm6 = vcmask 195584   ;;  %vm6972_vm8 = vcmask 523264   ;;  %vm6976_vm9 = vcmask 785408  }
  0x30   : > { %8974 = vmatprep.subr.bf16.mxu1 %v8973_v6  ;;  %v1692_v49 = vand.u32 4294901760, %v1691_v40  ;;  %v1705_v56 = vsub.f32 %v1579_v42, %v1603_v45 }
  0x31   : > { %8908 = vmatpush3.bf16.msra.mxu0 %v8905_v0 }
  0x32   : > { %8910 = vmatprep.subr.bf16.mxu0 %v8909_v5  ;;  %8401 = vmatmul.mubr.f32.vlgmr.msra.gmra.mrb[0].mxu1 %v1129_v10  ;;  %v1693_v55 = vsub.f32 %v1691_v40, %v1692_v49  ;;  %v1706_v62 = vand.u32 4294901760, %v1705_v56 }
  0x33   : > { %8976 = vmatpush3.bf16.msra.mxu1 %v8973_v6  ;;  %8411 = vmatprep.mubr.f32.mxu1 %v9987_v53  ;;  %v9005_v6 = vpack.c.bf16 %v1691_v40, %v1684_v39 }
  0x34   : > { %8313 = vmatmul.mubr.f32.vlgmr.msra.gmra.mrb[0].mxu0 %v9959_v35  ;;  %8978 = vmatprep.subr.bf16.mxu1 %v8977_v11  ;;  %v1694_v61 = vand.u32 4294901760, %v1693_v55  ;;  %v1707_v2 = vsub.f32 %v1705_v56, %v1706_v62 }
  0x35   : > { %8912 = vmatpush3.bf16.msra.mxu0 %v8909_v5  ;;  %8323 = vmatprep.mubr.f32.mxu0 %v9970_v43 }
  0x36   : > { %8914 = vmatprep.subr.bf16.mxu0 %v8913_v9  ;;  %v1708_v4 = vand.u32 4294901760, %v1707_v2 }
  0x37   : > { %8980 = vmatpush3.bf16.msra.mxu1 %v8977_v11 }
  0x38   : > { %8982 = vmatprep.subr.bf16.mxu1 %v9985_v52 }
  0x39   : > { %8916 = vmatpush3.bf16.msra.mxu0 %v8913_v9 }
  0x3a   : > { %8918 = vmatprep.subr.bf16.mxu0 %v9903_v12  ;;  %8412 = vmatmul.mubr.f32.vlgmr.msra.gmra.mrb[0].mxu1 %v9991_v57 }
  0x3b   : > { %8984 = vmatpush3.bf16.msra.mxu1 %v9985_v52  ;;  %8422 = vmatprep.mubr.f32.mxu1 %v9987_v53 }
  0x3c   : > { %8324 = vmatmul.mubr.f32.vlgmr.msra.gmra.mrb[0].mxu0 %v9973_v44  ;;  %8986 = vmatprep.subr.bf16.mxu1 %v10005_v1  ;;  %v1600_v44 = vand.u32 4294901760, %v1578_v41 }
  0x3d   : > { %8920 = vmatpush3.bf16.msra.mxu0 %v9903_v12  ;;  %8334 = vmatprep.mubr.f32.mxu0 %v574_v50 }
  0x3e   : > { %8922 = vmatprep.subr.bf16.mxu0 %v9921_v18  ;;  %v8993_v50 = vpack.c.bf16 %v1603_v45, %v1600_v44 }
  0x3f   : > { %8988 = vmatpush3.bf16.msra.mxu1 %v10005_v1 }
  0x41   : > { %8924 = vmatpush3.bf16.msra.mxu0 %v9921_v18 }
  0x42   : > { %8926 = vmatprep.subr.bf16.mxu0 %v8925_v16  ;;  %8423 = vmatmul.mubr.f32.vlgmr.msra.gmra.mrb[0].mxu1 %v9991_v57 }
  0x44   : > { %8335 = vmatmul.mubr.f32.vlgmr.msra.gmra.mrb[0].mxu0 %v584_v51  ;;  %v1674_v51 = vand.u32 4294901760, %v1673_v46 }
  0x45   : > { %8928 = vmatpush3.bf16.msra.mxu0 %v8925_v16  ;;  %8345 = vmatprep.mubr.f32.mxu0 %v9957_v34  ;;  %v7943_v16 = vld [vmem:[%s11114_s4] ss:$0 sm:$0xff] }
  0x46   : > { %8930 = vmatprep.subr.bf16.mxu0 %v8929_v17 }
  0x49   : > { %8932 = vmatpush3.bf16.msra.mxu0 %v8929_v17 }
  0x4a   : > { %8934 = vmatprep.subr.bf16.mxu0 %v9903_v12 }
  0x4c   : > { %8346 = vmatmul.mubr.f32.vlgmr.msra.gmra.mrb[0].mxu0 %v9959_v35 }
  0x4d   : > { %8936 = vmatpush3.bf16.msra.mxu0 %v9903_v12  ;;  %8356 = vmatprep.mubr.f32.mxu0 %v9957_v34  ;;  %v1162_v12 = vsub.f32 %v9979_v47, %v1161_v8  ;;  %v1588_v34 = vsel %vm496_vm0, %v483_v30, 0  ;;  %v1685_v47 = vand.u32 4294901760, %v1684_v39 }
  0x4e   : > { %8938 = vmatprep.subr.bf16.mxu0 %v9921_v18 }
  0x4f   : > { %v1163_v20 = vand.u32 4294901760, %v1162_v12  ;;  %v9021_v8 = vpack.c.bf16 %v1692_v49, %v1685_v47 }
  0x51   : > { %8940 = vmatpush3.bf16.msra.mxu0 %v9921_v18  ;;  %v8949_v18 = vpack.c.bf16 %v1149_v23, %v1142_v22  ;;  %v8953_v27 = vpack.c.bf16 %v1163_v20, %v1156_v19  ;;  %v7944_v20 = vld [vmem:[%s11116_s6] ss:$0 sm:$0xff] }
  0x52   : > { %8942 = vmatprep.subr.bf16.mxu0 %v9985_v52 }
  0x54   : > { %8357 = vmatmul.mubr.f32.vlgmr.msra.gmra.mrb[0].mxu0 %v9959_v35  ;;  %v10078_v35 = vand.u32 4294901760, %v1588_v34 }
  0x55   : > { %8944 = vmatpush3.bf16.msra.mxu0 %v9985_v52  ;;  %8367 = vmatprep.mubr.f32.mxu0 %v1121_v21  ;;  %v1686_v52 = vsub.f32 %v1684_v39, %v1685_v47 }
  0x56   : > { %8946 = vmatprep.subr.bf16.mxu0 %v10005_v1  ;;  %v1663_v43 = vsub.f32 %v1588_v34, %v10078_v35 }
  0x57   : > { %v1687_v58 = vand.u32 4294901760, %v1686_v52 }
  0x58   : > { %v1664_v48 = vand.u32 4294901760, %v1663_v43 }
  0x59   : > { %8948 = vmatpush3.bf16.msra.mxu0 %v10005_v1  ;;  %v8997_v1 = vpack.c.bf16 %v1694_v61, %v1687_v58 }
  0x5a   : > { %8950 = vmatprep.subr.bf16.mxu0 %v8949_v18  ;;  %v1665_v54 = vsub.f32 %v1663_v43, %v1664_v48 }
  0x5c   : > { %8368 = vmatmul.mubr.f32.vlgmr.msra.gmra.mrb[2].mxu0 %v1131_v26  ;;  %v1666_v60 = vand.u32 4294901760, %v1665_v54 }
  0x5d   : > { %8952 = vmatpush3.bf16.msra.mxu0 %v8949_v18  ;;  %8378 = vmatprep.mubr.f32.mxu0 %v9987_v53  ;;  %v1698_v53 = vsub.f32 %v1578_v41, %v1600_v44 }
  0x5e   : > { %8954 = vmatprep.subr.bf16.mxu0 %v8953_v27 }
  0x5f   : > { %v1699_v59 = vand.u32 4294901760, %v1698_v53  ;;  %v9009_v7 = vpack.c.bf16 %v1705_v56, %v1698_v53 }
  0x61   : > { %8956 = vmatpush3.bf16.msra.mxu0 %v8953_v27  ;;  %v1700_v0 = vsub.f32 %v1698_v53, %v1699_v59  ;;  %v9025_v9 = vpack.c.bf16 %v1706_v62, %v1699_v59 }
  0x62   : > { %8990 = vmatprep.subr.bf16.mxu0 %v10081_v37 }
  0x63   : > { %v1701_v3 = vand.u32 4294901760, %v1700_v0 }
  0x64   : > { %8379 = vmatmul.mubr.f32.vlgmr.msra.gmra.mrb[2].mxu0 %v9991_v57  ;;  %v1675_v57 = vsub.f32 %v1673_v46, %v1674_v51 }
  0x65   : > { %8992 = vmatpush3.bf16.msra.mxu0 %v10081_v37  ;;  %8433 = vmatprep.mubr.f32.mxu0 %v1666_v60  ;;  %v9001_v5 = vpack.c.bf16 %v1708_v4, %v1701_v3 }
  0x66   : > { %8994 = vmatprep.subr.bf16.mxu0 %v8993_v50  ;;  %v1676_v63 = vand.u32 4294901760, %v1675_v57 }
  0x69   : > { %8996 = vmatpush3.bf16.msra.mxu0 %v8993_v50 }
  0x6a   : > { %8998 = vmatprep.subr.bf16.mxu0 %v8997_v1 }
  0x6c   : > { %8434 = vmatmul.mubr.f32.vlgmr.msra.gmra.mrb[4].mxu0 %v1676_v63 }
  0x6d   : > { %8444 = vmatprep.mubr.f32.mxu0 %v10078_v35  ;;  %9000 = vmatpush3.bf16.msra.mxu0 %v8997_v1 }
  0x6e   : > { %9002 = vmatprep.subr.bf16.mxu0 %v9001_v5 }
  0x71   : > { %9004 = vmatpush3.bf16.msra.mxu0 %v9001_v5 }
  0x72   : > { %9006 = vmatprep.subr.bf16.mxu0 %v9005_v6 }
  0x74   : > { %8445 = vmatmul.mubr.f32.vlgmr.msra.gmra.mrb[4].mxu0 %v10083_v38 }
  0x75   : > { %9008 = vmatpush3.bf16.msra.mxu0 %v9005_v6  ;;  %8455 = vmatprep.mubr.f32.mxu0 %v1663_v43 }
  0x76   : > { %9010 = vmatprep.subr.bf16.mxu0 %v9009_v7 }
  0x79   : > { %9012 = vmatpush3.bf16.msra.mxu0 %v9009_v7 }
  0x7a   : > { %9014 = vmatprep.subr.bf16.mxu0 %v10081_v37 }
  0x7c   : > { %8456 = vmatmul.mubr.f32.vlgmr.msra.gmra.mrb[4].mxu0 %v1673_v46 }
  0x7d   : > { %9016 = vmatpush3.bf16.msra.mxu0 %v10081_v37  ;;  %8466 = vmatprep.mubr.f32.mxu0 %v1664_v48 }
  0x7e   : > { %9018 = vmatprep.subr.bf16.mxu0 %v8993_v50 }
  0x81   : > { %9020 = vmatpush3.bf16.msra.mxu0 %v8993_v50 }
  0x82   : > { %9022 = vmatprep.subr.bf16.mxu0 %v9021_v8 }
  0x84   : > { %8467 = vmatmul.mubr.f32.vlgmr.msra.gmra.mrb[4].mxu0 %v1674_v51 }
  0x85   : > { %9024 = vmatpush3.bf16.msra.mxu0 %v9021_v8  ;;  %8477 = vmatprep.mubr.f32.mxu0 %v10078_v35 }
  0x86   : > { %9026 = vmatprep.subr.bf16.mxu0 %v9025_v9 }
  0x89   : > { %9028 = vmatpush3.bf16.msra.mxu0 %v9025_v9 }
  0x8a   : > { %9030 = vmatprep.subr.bf16.mxu0 %v10081_v37 }
  0x8c   : > { %8478 = vmatmul.mubr.f32.vlgmr.msra.gmra.mrb[4].mxu0 %v10083_v38 }
  0x8d   : > { %9032 = vmatpush3.bf16.msra.mxu0 %v10081_v37  ;;  %8488 = vmatprep.mubr.f32.mxu0 %v10078_v35 }
  0x8e   : > { %9034 = vmatprep.subr.bf16.mxu0 %v8993_v50 }
  0x91   : > { %9036 = vmatpush3.bf16.msra.mxu0 %v8993_v50 }
  0x94   : > { %8489 = vmatmul.mubr.f32.vlgmr.msra.gmra.mrb[4].mxu0 %v10083_v38 }
 0x115   : > { %v8424_v10 = vpop.f32.mrb[0].mxu1 }
 0x116   : > { %v1566_v11 = vpop.f32.mrb[1].mxu1 }
 0x127   : > { %v8358_v17 = vpop.f32.mrb[0].mxu0 }
 0x128   : > { %v1021_v13 = vpop.f32.mrb[1].mxu0  ;;  %v9457_v15 = vadd.f32 %v8358_v17, %v7943_v16 }
 0x129   : > { %v9458_v14 = vadd.f32 %v7943_v16, %v1021_v13 }
 0x12a   : > { %v10114_v24 = vmul.f32 0.35355338, %v9457_v15 }
 0x12b   : > { %v10108_v21 = vmul.f32 0.35355338, %v9458_v14 }
 0x12c   : > { %v2128_v19 = vsel %vm2123_vm1, %v10114_v24, 0 }
 0x12d   : > { %v2125_v22 = vsel %vm2123_vm1, %v10108_v21, 0  ;;  %3169 = vrot.lane.b32.xlu1 %v10108_v21, %s9752_s15  ;;  %v2213_v28 = vand.u32 4294901760, %v2128_v19 }
 0x12e   : > { %v2203_v23 = vand.u32 4294901760, %v2125_v22 }
 0x12f   : > { %v2214_v34 = vsub.f32 %v2128_v19, %v2213_v28 }
 0x130   : > { %v2204_v12 = vsub.f32 %v2125_v22, %v2203_v23 }
 0x131   : > { %3171 = vrot.lane.b32.xlu1 %v10114_v24, %s9752_s15  ;;  %v2215_v41 = vand.u32 4294901760, %v2214_v34 }
 0x132   : > { %v2205_v25 = vand.u32 4294901760, %v2204_v12 }
 0x133   : > { %v2216_v46 = vsub.f32 %v2214_v34, %v2215_v41 }
 0x134   : > { %v2206_v18 = vsub.f32 %v2204_v12, %v2205_v25 }
 0x135   : > { %v2217_v50 = vand.u32 4294901760, %v2216_v46 }
 0x136   : > { %v2207_v26 = vand.u32 4294901760, %v2206_v18 }
 0x137   : > { %v8380_v27 = vpop.f32.mrb[2].mxu0 }
 0x138   : > { %v9459_v29 = vadd.f32 %v8380_v27, %v7944_v20  ;;  %v1224_v30 = vpop.f32.mrb[3].mxu0  ;;  %8495 = vmatprep.mubr.f32.mxu1 %v2207_v26  ;;  %v7945_v26 = vld [vmem:[%s11118_s8] ss:$0 sm:$0xff] }
 0x139   : > { %v9461_v31 = vadd.f32 %v7944_v20, %v1224_v30 }
 0x13a   : > { %v10123_v32 = vadd.f32 %v9459_v29, %v8424_v10  ;;  %v6911_v29 = vlaneseq }
 0x13b   : > { %v10125_v33 = vadd.f32 %v9461_v31, %v1566_v11 }
 0x13c   : > { %v2134_v35 = vsel %vm2123_vm1, %v10123_v32, 0 }
 0x13d   : > { %v2140_v36 = vand.u32 4294901760, %v2134_v35  ;;  %v2131_v37 = vsel %vm2123_vm1, %v10125_v33, 0  ;;  %3173 = vrot.lane.b32.xlu0 %v10125_v33, %s9752_s15 }
 0x13e   : > { %v2137_v38 = vand.u32 4294901760, %v2131_v37 }
 0x13f   : > { %v2232_v39 = vsub.f32 %v2134_v35, %v2140_v36 }
 0x140   : > { %v9037_v40 = vpack.c.bf16 %v2140_v36, %v2137_v38  ;;  %v2225_v42 = vsub.f32 %v2131_v37, %v2137_v38 }
 0x141   : > { %3175 = vrot.lane.b32.xlu0 %v10123_v32, %s9752_s15  ;;  %v2233_v43 = vand.u32 4294901760, %v2232_v39 }
 0x142   : > { %9038 = vmatprep.subr.bf16.mxu1 %v9037_v40  ;;  %v2226_v44 = vand.u32 4294901760, %v2225_v42  ;;  %v9045_v52 = vpack.c.bf16 %v2232_v39, %v2225_v42 }
 0x143   : > { %9040 = vmatpush3.bf16.xpose.msra.mxu1 %v9037_v40  ;;  %v2234_v45 = vsub.f32 %v2232_v39, %v2233_v43 }
 0x144   : > { %v2227_v47 = vsub.f32 %v2225_v42, %v2226_v44  ;;  %v9053_v53 = vpack.c.bf16 %v2233_v43, %v2226_v44 }
 0x145   : > { %v2235_v48 = vand.u32 4294901760, %v2234_v45 }
 0x146   : > { %v2228_v49 = vand.u32 4294901760, %v2227_v47 }
 0x148   : > { %v9041_v51 = vpack.c.bf16 %v2235_v48, %v2228_v49 }
 0x14a   : > { %8496 = vmatmul.mubr.f32.vlgmr.msra.gmra.mrb[2].mxu1 %v2217_v50  ;;  %9042 = vmatprep.subr.bf16.mxu1 %v9041_v51 }
 0x14b   : > { %9044 = vmatpush3.bf16.xpose.msra.mxu1 %v9041_v51  ;;  %8502 = vmatprep.mubr.f32.mxu1 %v2203_v23 }
 0x14c   : > { %9046 = vmatprep.subr.bf16.mxu1 %v9045_v52 }
 0x152   : > { %8503 = vmatmul.mubr.f32.vlgmr.msra.gmra.mrb[2].mxu1 %v2213_v28 }
 0x153   : > { %9048 = vmatpush3.bf16.xpose.msra.mxu1 %v9045_v52  ;;  %8509 = vmatprep.mubr.f32.mxu1 %v2204_v12 }
 0x154   : > { %9050 = vmatprep.subr.bf16.mxu1 %v9037_v40 }
 0x15a   : > { %8510 = vmatmul.mubr.f32.vlgmr.msra.gmra.mrb[2].mxu1 %v2214_v34  ;;  %v10148_v34 = vshrl.u32 %v6911_v29, 7 }
 0x15b   : > { %9052 = vmatpush3.bf16.xpose.msra.mxu1 %v9037_v40  ;;  %8516 = vmatprep.mubr.f32.mxu1 %v2205_v25 }
 0x15c   : > { %9054 = vmatprep.subr.bf16.mxu1 %v9053_v53  ;;  %vm6931_vm3 = vcmp.lt.s32.totalorder %v10148_v34, 6  ;;  %vm6919_vm4 = vcmp.lt.s32.totalorder %v10148_v34, 1  ;;  %vm6925_vm5 = vcmp.lt.s32.totalorder %v10148_v34, 7  ;;  %vm6913_vm7 = vcmp.lt.s32.totalorder %v10148_v34, 2 }
 0x162   : > { %8517 = vmatmul.mubr.f32.vlgmr.msra.gmra.mrb[2].mxu1 %v2215_v41 }
 0x163   : > { %9056 = vmatpush3.bf16.xpose.msra.mxu1 %v9053_v53  ;;  %8523 = vmatprep.mubr.f32.mxu1 %v2203_v23 }
 0x164   : > { %9058 = vmatprep.subr.bf16.mxu1 %v9037_v40 }
 0x167   : > { %v8490_v19 = vpop.f32.mrb[4].mxu0 }
 0x168   : > { %v2111_v20 = vpop.f32.mrb[5].mxu0  ;;  %v10142_v27 = vadd.f32 %v8490_v19, %v7945_v26 }
 0x16a   : > { %8524 = vmatmul.mubr.f32.vlgmr.msra.gmra.mrb[2].mxu1 %v2213_v28  ;;  %v2667_v31 = vand.u32 4294901760, %v10142_v27  ;;  %v6930_v42 = vrot.slane %v10142_v27, 2 }
 0x16b   : > { %9060 = vmatpush3.bf16.xpose.msra.mxu1 %v9037_v40  ;;  %8530 = vmatprep.mubr.f32.mxu1 %v2203_v23 }
 0x16c   : > { %v2759_v38 = vsub.f32 %v10142_v27, %v2667_v31  ;;  %v10165_v49 = vsel %vm6931_vm3, %v6930_v42, 0.0 }
 0x16e   : > { %v2760_v45 = vand.u32 4294901760, %v2759_v38 }
 0x170   : > { %v2761_v47 = vsub.f32 %v2759_v38, %v2760_v45 }
 0x172   : > { %8531 = vmatmul.mubr.f32.vlgmr.msra.gmra.mrb[2].mxu1 %v2213_v28  ;;  %v10144_v28 = vadd.f32 %v7945_v26, %v2111_v20  ;;  %v2762_v52 = vand.u32 4294901760, %v2761_v47 }
 0x174   : > { %v2664_v30 = vand.u32 4294901760, %v10144_v28  ;;  %v6929_v41 = vrot.slane %v10144_v28, 2 }
 0x176   : > { %v10150_v36 = vpack.c.bf16 %v2667_v31, %v2664_v30  ;;  %v2752_v37 = vsub.f32 %v10144_v28, %v2664_v30  ;;  %v10171_v50 = vsel %vm6931_vm3, 0.0, %v6929_v41 }
 0x178   : > { %9062 = vmatprep.subr.bf16.mxu0 %v10150_v36  ;;  %v2753_v44 = vand.u32 4294901760, %v2752_v37  ;;  %v9069_v48 = vpack.c.bf16 %v2759_v38, %v2752_v37 }
 0x179   : > { %9064 = vmatpush3.bf16.msra.mxu0 %v10150_v36 }
 0x17a   : > { %v2754_v46 = vsub.f32 %v2752_v37, %v2753_v44  ;;  %v9077_v53 = vpack.c.bf16 %v2760_v45, %v2753_v44 }
 0x17c   : > { %v2755_v51 = vand.u32 4294901760, %v2754_v46 }
 0x19f   : > { %v3170_v54 = vpop.permute.xlu1 %3169 }
 0x1a0   : > { %v3177_v55 = vsel %vm2123_vm1, %v3170_v54, 0  ;;  %v9065_v54 = vpack.c.bf16 %v2762_v52, %v2755_v51 }
 0x1a1   : > { %v3252_v56 = vand.u32 4294901760, %v3177_v55 }
 0x1a2   : > { %9066 = vmatprep.subr.bf16.mxu0 %v9065_v54 }
 0x1a3   : > { %v3253_v57 = vsub.f32 %v3177_v55, %v3252_v56  ;;  %v3172_v60 = vpop.permute.xlu1 %3171 }
 0x1a4   : > { %v3179_v62 = vsel %vm2123_vm1, %v3172_v60, 0 }
 0x1a5   : > { %v3254_v58 = vand.u32 4294901760, %v3253_v57  ;;  %v3262_v63 = vand.u32 4294901760, %v3179_v62 }
 0x1a7   : > { %v3255_v59 = vsub.f32 %v3253_v57, %v3254_v58  ;;  %v3263_v3 = vsub.f32 %v3179_v62, %v3262_v63 }
 0x1a9   : > { %v3256_v61 = vand.u32 4294901760, %v3255_v59  ;;  %v3264_v9 = vand.u32 4294901760, %v3263_v3 }
 0x1ab   : > { %8579 = vmatprep.mubr.f32.mxu1 %v3256_v61  ;;  %v3265_v13 = vsub.f32 %v3263_v3, %v3264_v9 }
 0x1ad   : > { %v3266_v23 = vand.u32 4294901760, %v3265_v13 }
 0x1af   : > { %v3174_v0 = vpop.permute.xlu0 %3173 }
 0x1b0   : > { %v3181_v1 = vsel %vm2123_vm1, %v3174_v0, 0 }
 0x1b1   : > { %v3186_v2 = vand.u32 4294901760, %v3181_v1 }
 0x1b3   : > { %v3274_v4 = vsub.f32 %v3181_v1, %v3186_v2  ;;  %v3176_v5 = vpop.permute.xlu0 %3175 }
 0x1b4   : > { %v3183_v6 = vsel %vm2123_vm1, %v3176_v5, 0 }
 0x1b5   : > { %v3275_v7 = vand.u32 4294901760, %v3274_v4  ;;  %v3189_v8 = vand.u32 4294901760, %v3183_v6 }
 0x1b7   : > { %v9085_v10 = vpack.c.bf16 %v3189_v8, %v3186_v2  ;;  %v3281_v11 = vsub.f32 %v3183_v6, %v3189_v8  ;;  %v3276_v16 = vsub.f32 %v3274_v4, %v3275_v7 }
 0x1b9   : > { %v3282_v17 = vand.u32 4294901760, %v3281_v11  ;;  %9086 = vmatprep.subr.bf16.mxu1 %v9085_v10  ;;  %v3277_v15 = vand.u32 4294901760, %v3276_v16  ;;  %v9093_v25 = vpack.c.bf16 %v3281_v11, %v3274_v4 }
 0x1ba   : > { %9088 = vmatpush3.bf16.xpose.msra.mxu1 %v9085_v10 }
 0x1bb   : > { %v3283_v14 = vsub.f32 %v3281_v11, %v3282_v17  ;;  %v9101_v18 = vpack.c.bf16 %v3282_v17, %v3275_v7 }
 0x1bd   : > { %v3284_v22 = vand.u32 4294901760, %v3283_v14 }
 0x1bf   : > { %v9089_v12 = vpack.c.bf16 %v3284_v22, %v3277_v15 }
 0x1c1   : > { %8580 = vmatmul.mubr.f32.vlgmr.msra.gmra.mrb[4].mxu1 %v3266_v23  ;;  %9090 = vmatprep.subr.bf16.mxu1 %v9089_v12 }
 0x1c2   : > { %9092 = vmatpush3.bf16.xpose.msra.mxu1 %v9089_v12  ;;  %8586 = vmatprep.mubr.f32.mxu1 %v3252_v56 }
 0x1c3   : > { %9094 = vmatprep.subr.bf16.mxu1 %v9093_v25 }
 0x1c9   : > { %8587 = vmatmul.mubr.f32.vlgmr.msra.gmra.mrb[4].mxu1 %v3262_v63 }
 0x1ca   : > { %9096 = vmatpush3.bf16.xpose.msra.mxu1 %v9093_v25  ;;  %8593 = vmatprep.mubr.f32.mxu1 %v3253_v57 }
 0x1cb   : > { %9098 = vmatprep.subr.bf16.mxu1 %v9085_v10 }
 0x1d1   : > { %8594 = vmatmul.mubr.f32.vlgmr.msra.gmra.mrb[4].mxu1 %v3263_v3 }
 0x1d2   : > { %9100 = vmatpush3.bf16.xpose.msra.mxu1 %v9085_v10  ;;  %8600 = vmatprep.mubr.f32.mxu1 %v3254_v58 }
 0x1d3   : > { %9102 = vmatprep.subr.bf16.mxu1 %v9101_v18 }
 0x1d9   : > { %8601 = vmatmul.mubr.f32.vlgmr.msra.gmra.mrb[4].mxu1 %v3264_v9 }
 0x1da   : > { %9104 = vmatpush3.bf16.xpose.msra.mxu1 %v9101_v18  ;;  %8607 = vmatprep.mubr.f32.mxu1 %v3252_v56 }
 0x1db   : > { %9106 = vmatprep.subr.bf16.mxu1 %v9085_v10 }
 0x1e1   : > { %8608 = vmatmul.mubr.f32.vlgmr.msra.gmra.mrb[4].mxu1 %v3262_v63 }
 0x1e2   : > { %9108 = vmatpush3.bf16.xpose.msra.mxu1 %v9085_v10  ;;  %8614 = vmatprep.mubr.f32.mxu1 %v3252_v56 }
 0x1e9   : > { %8615 = vmatmul.mubr.f32.vlgmr.msra.gmra.mrb[4].mxu1 %v3262_v63 }
 0x245   : > { %v8532_v35 = vpop.f32.mrb[2].mxu1 }
 0x246   : > { %v2628_v39 = vpop.f32.mrb[3].mxu1  ;;  %v2642_v40 = vsel %vm2638_vm2, %v8532_v35, -inf }
 0x247   : > { %2643 = vmax.xlane.f32.xlu1 %v2642_v40  ;;  %v2639_v43 = vsel %vm2638_vm2, %v2628_v39, -inf }
 0x248   : > { %2640 = vmax.xlane.f32.xlu0 %v2639_v43 }
 0x258   : > { %3707 = vrot.lane.b32.xlu1 %v10144_v28, %s9752_s15 }
 0x25c   : > { %4229 = vrot.lane.b32.xlu1 %v10125_v33, %s9753_s22 }
 0x260   : > { %4231 = vrot.lane.b32.xlu1 %v10123_v32, %s9753_s22 }
 0x264   : > { %4227 = vrot.lane.b32.xlu1 %v10114_v24, %s9753_s22 }
 0x2bc   : > { %v8616_v55 = vpop.f32.mrb[4].mxu1 }
 0x2bd   : > { %v3677_v56 = vpop.f32.mrb[5].mxu1  ;;  %v3690_v58 = vsel %vm2638_vm2, %v8616_v55, -inf }
 0x2be   : > { %v3687_v57 = vsel %vm2638_vm2, %v3677_v56, -inf }
 0x2bf   : > { %3688 = vmax.xlane.f32.xlu0 %v3687_v57 }
 0x2c3   : > { %3691 = vmax.xlane.f32.xlu0 %v3690_v58 }
 0x2d4   : > { %v2644_v59 = vpop.xlane.xlu1 %2643 }
 0x2d5   : > { %v2646_v60 = vsub.f32 %v8532_v35, %v2644_v59  ;;  %v2641_v61 = vpop.xlane.xlu0 %2640 }
 0x2d6   : > { %v2645_v62 = vsub.f32 %v2628_v39, %v2641_v61 }
 0x2d7   : > { %v2649_v63 = vmul.f32 1.442695, %v2646_v60 }
 0x2d8   : > { %v2647_v0 = vmul.f32 1.442695, %v2645_v62  ;;  %v3708_v14 = vpop.permute.xlu1 %3707 }
 0x2d9   : > { %9656 = vpow2.f32 %v2649_v63  ;;  %3709 = vrot.lane.b32.xlu0 %v10142_v27, %s9752_s15  ;;  %v3720_v22 = vand.u32 4294901760, %v3708_v14 }
 0x2da   : > { %9658 = vpow2.f32 %v2647_v0 }
 0x2db   : > { %v3808_v18 = vsub.f32 %v3708_v14, %v3720_v22 }
 0x2dc   : > { %v4230_v61 = vpop.permute.xlu1 %4229 }
 0x2dd   : > { %4225 = vrot.lane.b32.xlu0 %v10108_v21, %s9753_s22  ;;  %v3809_v29 = vand.u32 4294901760, %v3808_v18 }
 0x2e0   : > { %v4232_v62 = vpop.permute.xlu1 %4231 }
 0x2e3   : > { %v10187_v1 = vpop.eup %9656 }
 0x2e4   : > { %v10189_v2 = vpop.eup %9658  ;;  %v2661_v3 = vsel %vm2638_vm2, %v10187_v1, 0 }
 0x2e5   : > { %v2740_v4 = vand.u32 4294901760, %v2661_v3  ;;  %v2658_v5 = vsel %vm2638_vm2, %v10189_v2, 0 }
 0x2e6   : > { %v2730_v6 = vand.u32 4294901760, %v2658_v5 }
 0x2e7   : > { %v2741_v7 = vsub.f32 %v2661_v3, %v2740_v4  ;;  %v4239_v3 = vsel %vm2123_vm1, %v4232_v62, 0 }
 0x2e8   : > { %v2731_v8 = vsub.f32 %v2658_v5, %v2730_v6 }
 0x2e9   : > { %v2742_v9 = vand.u32 4294901760, %v2741_v7 }
 0x2ea   : > { %v2732_v10 = vand.u32 4294901760, %v2731_v8 }
 0x2eb   : > { %v2743_v11 = vsub.f32 %v2741_v7, %v2742_v9 }
 0x2ec   : > { %v2733_v16 = vsub.f32 %v2731_v8, %v2732_v10 }
 0x2ed   : > { %v2744_v13 = vand.u32 4294901760, %v2743_v11 }
 0x2ee   : > { %v2734_v17 = vand.u32 4294901760, %v2733_v16 }
 0x2f0   : > { %8537 = vmatprep.mubr.f32.mxu0 %v2734_v17 }
 0x2f1   : > { %8538 = vmatmul.mubr.f32.vlgmr.msra.gmra.mrb[6].mxu0 %v2744_v13 }
 0x2f2   : > { %9068 = vmatpush3.bf16.msra.mxu0 %v9065_v54  ;;  %8544 = vmatprep.mubr.f32.mxu0 %v2730_v6 }
 0x2f3   : > { %9070 = vmatprep.subr.bf16.mxu0 %v9069_v48 }
 0x2f9   : > { %8545 = vmatmul.mubr.f32.vlgmr.msra.gmra.mrb[6].mxu0 %v2740_v4 }
 0x2fa   : > { %9072 = vmatpush3.bf16.msra.mxu0 %v9069_v48  ;;  %8551 = vmatprep.mubr.f32.mxu0 %v2731_v8 }
 0x2fb   : > { %9074 = vmatprep.subr.bf16.mxu0 %v10150_v36 }
 0x301   : > { %8552 = vmatmul.mubr.f32.vlgmr.msra.gmra.mrb[6].mxu0 %v2741_v7 }
 0x302   : > { %9076 = vmatpush3.bf16.msra.mxu0 %v10150_v36  ;;  %8558 = vmatprep.mubr.f32.mxu0 %v2732_v10  ;;  %v4228_v10 = vpop.permute.xlu1 %4227 }
 0x303   : > { %9078 = vmatprep.subr.bf16.mxu0 %v9077_v53  ;;  %v4235_v17 = vsel %vm2123_vm1, %v4228_v10, 0 }
 0x309   : > { %8559 = vmatmul.mubr.f32.vlgmr.msra.gmra.mrb[6].mxu0 %v2742_v9 }
 0x30a   : > { %9080 = vmatpush3.bf16.msra.mxu0 %v9077_v53  ;;  %8565 = vmatprep.mubr.f32.mxu0 %v2730_v6 }
 0x30b   : > { %9082 = vmatprep.subr.bf16.mxu0 %v10150_v36 }
 0x311   : > { %8566 = vmatmul.mubr.f32.vlgmr.msra.gmra.mrb[6].mxu0 %v2740_v4 }
 0x312   : > { %9084 = vmatpush3.bf16.msra.mxu0 %v10150_v36  ;;  %8572 = vmatprep.mubr.f32.mxu0 %v2730_v6  ;;  %v3810_v36 = vsub.f32 %v3808_v18, %v3809_v29  ;;  %v4245_v6 = vand.u32 4294901760, %v4239_v3 }
 0x314   : > { %v3811_v43 = vand.u32 4294901760, %v3810_v36  ;;  %v4337_v9 = vsub.f32 %v4239_v3, %v4245_v6 }
 0x316   : > { %v4338_v13 = vand.u32 4294901760, %v4337_v9 }
 0x319   : > { %8573 = vmatmul.mubr.f32.vlgmr.msra.gmra.mrb[6].mxu0 %v2740_v4  ;;  %v4237_v4 = vsel %vm2123_vm1, %v4230_v61, 0 }
 0x31a   : > { %v4242_v7 = vand.u32 4294901760, %v4237_v4 }
 0x31c   : > { %v4330_v11 = vsub.f32 %v4237_v4, %v4242_v7 }
 0x31e   : > { %v4331_v14 = vand.u32 4294901760, %v4330_v11 }
 0x34c   : > { %v3689_v15 = vpop.xlane.xlu0 %3688 }
 0x34d   : > { %v3693_v23 = vsub.f32 %v3677_v56, %v3689_v15  ;;  %v4318_v15 = vand.u32 4294901760, %v4235_v17 }
 0x34f   : > { %v3695_v12 = vmul.f32 1.442695, %v3693_v23  ;;  %v9133_v23 = vpack.c.bf16 %v4245_v6, %v4242_v7 }
 0x350   : > { %v3692_v25 = vpop.xlane.xlu0 %3691 }
 0x351   : > { %9660 = vpow2.f32 %v3695_v12  ;;  %v3694_v19 = vsub.f32 %v8616_v55, %v3692_v25  ;;  %v4339_v12 = vsub.f32 %v4337_v9, %v4338_v13  ;;  %v4332_v25 = vsub.f32 %v4330_v11, %v4331_v14 }
 0x353   : > { %v3697_v20 = vmul.f32 1.442695, %v3694_v19 }
 0x354   : > { %v3710_v26 = vpop.permute.xlu0 %3709 }
 0x355   : > { %9662 = vpow2.f32 %v3697_v20  ;;  %v3723_v30 = vand.u32 4294901760, %v3710_v26  ;;  %v4340_v20 = vand.u32 4294901760, %v4339_v12 }
 0x357   : > { %v10199_v31 = vpack.c.bf16 %v3723_v30, %v3720_v22  ;;  %v3815_v35 = vsub.f32 %v3710_v26, %v3723_v30  ;;  %v4333_v30 = vand.u32 4294901760, %v4332_v25 }
 0x358   : > { %v4226_v0 = vpop.permute.xlu0 %4225 }
 0x359   : > { %v3816_v37 = vand.u32 4294901760, %v3815_v35  ;;  %9110 = vmatprep.subr.bf16.mxu0 %v10199_v31  ;;  %v9117_v60 = vpack.c.bf16 %v3815_v35, %v3808_v18  ;;  %v4233_v5 = vsel %vm2123_vm1, %v4226_v0, 0  ;;  %v4319_v18 = vsub.f32 %v4235_v17, %v4318_v15 }
 0x35a   : > { %9112 = vmatpush3.bf16.msra.mxu0 %v10199_v31  ;;  %v4308_v8 = vand.u32 4294901760, %v4233_v5 }
 0x35b   : > { %v10203_v38 = vpop.eup %9660  ;;  %v3817_v39 = vsub.f32 %v3815_v35, %v3816_v37  ;;  %v9125_v63 = vpack.c.bf16 %v3816_v37, %v3809_v29  ;;  %v4320_v26 = vand.u32 4294901760, %v4319_v18  ;;  %v9137_v35 = vpack.c.bf16 %v4340_v20, %v4333_v30 }
 0x35c   : > { %v3714_v40 = vsel %vm2638_vm2, %v10203_v38, 0  ;;  %v4309_v16 = vsub.f32 %v4233_v5, %v4308_v8 }
 0x35d   : > { %v3818_v44 = vand.u32 4294901760, %v3817_v39  ;;  %v3786_v45 = vand.u32 4294901760, %v3714_v40  ;;  %v4321_v36 = vsub.f32 %v4319_v18, %v4320_v26  ;;  %v9141_v39 = vpack.c.bf16 %v4337_v9, %v4330_v11 }
 0x35e   : > { %v4310_v22 = vand.u32 4294901760, %v4309_v16 }
 0x35f   : > { %v10207_v46 = vpop.eup %9662  ;;  %v9113_v47 = vpack.c.bf16 %v3818_v44, %v3811_v43  ;;  %v3787_v48 = vsub.f32 %v3714_v40, %v3786_v45  ;;  %v4322_v37 = vand.u32 4294901760, %v4321_v36 }
 0x360   : > { %v3717_v51 = vsel %vm2638_vm2, %v10207_v46, 0  ;;  %v4311_v19 = vsub.f32 %v4309_v16, %v4310_v22 }
 0x361   : > { %v3796_v52 = vand.u32 4294901760, %v3717_v51  ;;  %9114 = vmatprep.subr.bf16.mxu0 %v9113_v47  ;;  %v3788_v53 = vand.u32 4294901760, %v3787_v48 }
 0x362   : > { %v4312_v29 = vand.u32 4294901760, %v4311_v19 }
 0x363   : > { %v3789_v54 = vsub.f32 %v3787_v48, %v3788_v53  ;;  %v3797_v55 = vsub.f32 %v3717_v51, %v3796_v52 }
 0x365   : > { %v3790_v56 = vand.u32 4294901760, %v3789_v54  ;;  %v3798_v57 = vand.u32 4294901760, %v3797_v55 }
 0x367   : > { %8621 = vmatprep.mubr.f32.mxu0 %v3790_v56  ;;  %v3799_v58 = vsub.f32 %v3797_v55, %v3798_v57 }
 0x369   : > { %v3800_v59 = vand.u32 4294901760, %v3799_v58 }
 0x36b   : > { %8622 = vmatmul.mubr.f32.vlgmr.msra.gmra.mrb[8].mxu0 %v3800_v59 }
 0x36c   : > { %9116 = vmatpush3.bf16.msra.mxu0 %v9113_v47  ;;  %8628 = vmatprep.mubr.f32.mxu0 %v3786_v45 }
 0x36d   : > { %9118 = vmatprep.subr.bf16.mxu0 %v9117_v60 }
 0x373   : > { %8629 = vmatmul.mubr.f32.vlgmr.msra.gmra.mrb[8].mxu0 %v3796_v52 }
 0x374   : > { %9120 = vmatpush3.bf16.msra.mxu0 %v9117_v60  ;;  %8635 = vmatprep.mubr.f32.mxu0 %v3787_v48 }
 0x375   : > { %9122 = vmatprep.subr.bf16.mxu0 %v10199_v31 }
 0x37b   : > { %8636 = vmatmul.mubr.f32.vlgmr.msra.gmra.mrb[8].mxu0 %v3797_v55 }
 0x37c   : > { %9124 = vmatpush3.bf16.msra.mxu0 %v10199_v31  ;;  %8642 = vmatprep.mubr.f32.mxu0 %v3788_v53 }
 0x37d   : > { %9126 = vmatprep.subr.bf16.mxu0 %v9125_v63 }
 0x383   : > { %8643 = vmatmul.mubr.f32.vlgmr.msra.gmra.mrb[8].mxu0 %v3798_v57 }
 0x384   : > { %9128 = vmatpush3.bf16.msra.mxu0 %v9125_v63  ;;  %8649 = vmatprep.mubr.f32.mxu0 %v3786_v45 }
 0x385   : > { %9130 = vmatprep.subr.bf16.mxu0 %v10199_v31 }
 0x38b   : > { %8650 = vmatmul.mubr.f32.vlgmr.msra.gmra.mrb[8].mxu0 %v3796_v52 }
 0x38c   : > { %9132 = vmatpush3.bf16.msra.mxu0 %v10199_v31  ;;  %8656 = vmatprep.mubr.f32.mxu0 %v3786_v45  ;;  %v9149_v31 = vpack.c.bf16 %v4338_v13, %v4331_v14 }
 0x38d   : > { %9134 = vmatprep.subr.bf16.mxu0 %v9133_v23 }
 0x393   : > { %8657 = vmatmul.mubr.f32.vlgmr.msra.gmra.mrb[8].mxu0 %v3796_v52 }
 0x394   : > { %8663 = vmatprep.mubr.f32.mxu0 %v4312_v29 }
 0x395   : > { %9136 = vmatpush3.bf16.xpose.msra.mxu0 %v9133_v23 }
 0x396   : > { %9138 = vmatprep.subr.bf16.mxu0 %v9137_v35 }
 0x39c   : > { %8664 = vmatmul.mubr.f32.vlgmr.msra.gmra.mrb[10].mxu0 %v4322_v37 }
 0x39d   : > { %9140 = vmatpush3.bf16.xpose.msra.mxu0 %v9137_v35  ;;  %8670 = vmatprep.mubr.f32.mxu0 %v4308_v8 }
 0x39e   : > { %9142 = vmatprep.subr.bf16.mxu0 %v9141_v39 }
 0x3a4   : > { %8671 = vmatmul.mubr.f32.vlgmr.msra.gmra.mrb[10].mxu0 %v4318_v15 }
 0x3a5   : > { %9144 = vmatpush3.bf16.xpose.msra.mxu0 %v9141_v39  ;;  %8677 = vmatprep.mubr.f32.mxu0 %v4309_v16 }
 0x3a6   : > { %9146 = vmatprep.subr.bf16.mxu0 %v9133_v23 }
 0x3ac   : > { %8678 = vmatmul.mubr.f32.vlgmr.msra.gmra.mrb[10].mxu0 %v4319_v18 }
 0x3ad   : > { %9148 = vmatpush3.bf16.xpose.msra.mxu0 %v9133_v23  ;;  %8684 = vmatprep.mubr.f32.mxu0 %v4310_v22 }
 0x3ae   : > { %9150 = vmatprep.subr.bf16.mxu0 %v9149_v31 }
 0x3b4   : > { %8685 = vmatmul.mubr.f32.vlgmr.msra.gmra.mrb[10].mxu0 %v4320_v26 }
 0x3b5   : > { %9152 = vmatpush3.bf16.xpose.msra.mxu0 %v9149_v31  ;;  %8691 = vmatprep.mubr.f32.mxu0 %v4308_v8 }
 0x3b6   : > { %9154 = vmatprep.subr.bf16.mxu0 %v9133_v23 }
 0x3bc   : > { %8692 = vmatmul.mubr.f32.vlgmr.msra.gmra.mrb[10].mxu0 %v4318_v15 }
 0x3bd   : > { %9156 = vmatpush3.bf16.xpose.msra.mxu0 %v9133_v23  ;;  %8698 = vmatprep.mubr.f32.mxu0 %v4308_v8 }
 0x3c4   : > { %8699 = vmatmul.mubr.f32.vlgmr.msra.gmra.mrb[10].mxu0 %v4318_v15 }
 0x3ec   : > { %v10219_v40 = vpop.f32.mrb[6].mxu0 }
 0x3ed   : > { %v10221_v43 = vpop.f32.mrb[7].mxu0 }
 0x466   : > { %v10223_v44 = vpop.f32.mrb[8].mxu0 }
 0x467   : > { %v10225_v45 = vpop.f32.mrb[9].mxu0 }
 0x497   : > { %v8700_v47 = vpop.f32.mrb[10].mxu0 }
 0x498   : > { %v4733_v48 = vpop.f32.mrb[11].mxu0  ;;  %v4746_v51 = vsel %vm2638_vm2, %v8700_v47, -inf }
 0x499   : > { %4747 = vmax.xlane.f32.xlu1 %v4746_v51  ;;  %v4743_v52 = vsel %vm2638_vm2, %v4733_v48, -inf }
 0x49a   : > { %4744 = vmax.xlane.f32.xlu0 %v4743_v52 }
 0x4aa   : > { %4763 = vrot.lane.b32.xlu1 %v10142_v27, %s9753_s22 }
 0x4ae   : > { %5285 = vrot.lane.b32.xlu1 %v10123_v32, %s9754_s23 }
 0x4b0   : > { %4761 = vrot.lane.b32.xlu0 %v10144_v28, %s9753_s22  ;;  %s9761_s22 = smov 96  }
 0x4b2   : > { %5281 = vrot.lane.b32.xlu1 %v10114_v24, %s9754_s23 }
 0x4b4   : > { %5283 = vrot.lane.b32.xlu0 %v10125_v33, %s9754_s23 }
 0x4b8   : > { %5279 = vrot.lane.b32.xlu0 %v10108_v21, %s9754_s23 }
 0x526   : > { %v4748_v53 = vpop.xlane.xlu1 %4747 }
 0x527   : > { %v4750_v54 = vsub.f32 %v8700_v47, %v4748_v53  ;;  %v4745_v55 = vpop.xlane.xlu0 %4744 }
 0x528   : > { %v4749_v56 = vsub.f32 %v4733_v48, %v4745_v55 }
 0x529   : > { %v4753_v57 = vmul.f32 1.442695, %v4750_v54 }
 0x52a   : > { %v4751_v58 = vmul.f32 1.442695, %v4749_v56  ;;  %v4764_v59 = vpop.permute.xlu1 %4763 }
 0x52b   : > { %9664 = vpow2.f32 %v4753_v57  ;;  %v4777_v32 = vand.u32 4294901760, %v4764_v59  ;;  %v4762_v60 = vpop.permute.xlu0 %4761 }
 0x52c   : > { %9666 = vpow2.f32 %v4751_v58  ;;  %v4774_v61 = vand.u32 4294901760, %v4762_v60 }
 0x52d   : > { %v4869_v62 = vsub.f32 %v4764_v59, %v4777_v32 }
 0x52e   : > { %v10241_v24 = vpack.c.bf16 %v4777_v32, %v4774_v61  ;;  %v4862_v63 = vsub.f32 %v4762_v60, %v4774_v61  ;;  %v5286_v20 = vpop.permute.xlu1 %5285 }
 0x52f   : > { %v4870_v33 = vand.u32 4294901760, %v4869_v62  ;;  %v5284_v19 = vpop.permute.xlu0 %5283  ;;  %v5293_v30 = vsel %vm2123_vm1, %v5286_v20, 0 }
 0x530   : > { %v4863_v0 = vand.u32 4294901760, %v4862_v63  ;;  %9158 = vmatprep.subr.bf16.mxu1 %v10241_v24  ;;  %v9165_v18 = vpack.c.bf16 %v4869_v62, %v4862_v63  ;;  %v5291_v35 = vsel %vm2123_vm1, %v5284_v19, 0  ;;  %v5299_v37 = vand.u32 4294901760, %v5293_v30 }
 0x531   : > { %v4871_v21 = vsub.f32 %v4869_v62, %v4870_v33  ;;  %9160 = vmatpush3.bf16.msra.mxu1 %v10241_v24  ;;  %v5296_v39 = vand.u32 4294901760, %v5291_v35 }
 0x532   : > { %v4864_v3 = vsub.f32 %v4862_v63, %v4863_v0  ;;  %v9173_v26 = vpack.c.bf16 %v4870_v33, %v4863_v0  ;;  %v5391_v47 = vsub.f32 %v5293_v30, %v5299_v37  ;;  %v5282_v51 = vpop.permute.xlu1 %5281 }
 0x533   : > { %v4872_v4 = vand.u32 4294901760, %v4871_v21  ;;  %v5280_v29 = vpop.permute.xlu0 %5279  ;;  %v5384_v48 = vsub.f32 %v5291_v35, %v5296_v39  ;;  %v5289_v53 = vsel %vm2123_vm1, %v5282_v51, 0  ;;  %v9181_v58 = vpack.c.bf16 %v5299_v37, %v5296_v39 }
 0x534   : > { %v4865_v5 = vand.u32 4294901760, %v4864_v3  ;;  %v5287_v36 = vsel %vm2123_vm1, %v5280_v29, 0  ;;  %v5392_v54 = vand.u32 4294901760, %v5391_v47  ;;  %v5372_v56 = vand.u32 4294901760, %v5289_v53 }
 0x535   : > { %v10245_v6 = vpop.eup %9664  ;;  %v5362_v31 = vand.u32 4294901760, %v5287_v36  ;;  %v5385_v55 = vand.u32 4294901760, %v5384_v48 }
 0x536   : > { %v10247_v7 = vpop.eup %9666  ;;  %v4771_v8 = vsel %vm2638_vm2, %v10245_v6, 0  ;;  %v9161_v9 = vpack.c.bf16 %v4872_v4, %v4865_v5  ;;  %v5393_v59 = vsub.f32 %v5391_v47, %v5392_v54  ;;  %v5373_v60 = vsub.f32 %v5289_v53, %v5372_v56 }
 0x537   : > { %v4850_v10 = vand.u32 4294901760, %v4771_v8  ;;  %v4768_v11 = vsel %vm2638_vm2, %v10247_v7, 0  ;;  %v5363_v52 = vsub.f32 %v5287_v36, %v5362_v31  ;;  %v5386_v32 = vsub.f32 %v5384_v48, %v5385_v55 }
 0x538   : > { %9162 = vmatprep.subr.bf16.mxu1 %v9161_v9  ;;  %v4840_v16 = vand.u32 4294901760, %v4768_v11  ;;  %v5394_v63 = vand.u32 4294901760, %v5393_v59  ;;  %v5374_v33 = vand.u32 4294901760, %v5373_v60  ;;  %v9189_v5 = vpack.c.bf16 %v5391_v47, %v5384_v48 }
 0x539   : > { %v4851_v17 = vsub.f32 %v4771_v8, %v4850_v10  ;;  %v5364_v57 = vand.u32 4294901760, %v5363_v52  ;;  %v5387_v62 = vand.u32 4294901760, %v5386_v32  ;;  %v6933_v8 = vsel %vm6931_vm3, %v6929_v41, %v6930_v42 }
 0x53a   : > { %v4841_v13 = vsub.f32 %v4768_v11, %v4840_v16  ;;  %v5375_v3 = vsub.f32 %v5373_v60, %v5374_v33 }
 0x53b   : > { %v4852_v14 = vand.u32 4294901760, %v4851_v17  ;;  %v5365_v61 = vsub.f32 %v5363_v52, %v5364_v57  ;;  %v9185_v21 = vpack.c.bf16 %v5394_v63, %v5387_v62  ;;  %v2651_v63 = vsel %vm2638_vm2, %v10189_v2, 0.0 }
 0x53c   : > { %v4842_v15 = vand.u32 4294901760, %v4841_v13  ;;  %v5376_v4 = vand.u32 4294901760, %v5375_v3 }
 0x53d   : > { %v4853_v22 = vsub.f32 %v4851_v17, %v4852_v14  ;;  %v5366_v0 = vand.u32 4294901760, %v5365_v61  ;;  %v2654_v61 = vsel %vm2638_vm2, %v10187_v1, 0.0 }
 0x53e   : > { %v4843_v23 = vsub.f32 %v4841_v13, %v4842_v15 }
 0x53f   : > { %v4854_v25 = vand.u32 4294901760, %v4853_v22  ;;  %v3699_v22 = vsel %vm2638_vm2, %v10203_v38, 0.0 }
 0x540   : > { %v4844_v12 = vand.u32 4294901760, %v4843_v23  ;;  %v4755_v23 = vsel %vm2638_vm2, %v10247_v7, 0.0 }
 0x542   : > { %8705 = vmatprep.mubr.f32.mxu1 %v4844_v12  ;;  %v4758_v12 = vsel %vm2638_vm2, %v10245_v6, 0.0 }
 0x543   : > { %8706 = vmatmul.mubr.f32.vlgmr.msra.gmra.mrb[6].mxu1 %v4854_v25 }
 0x544   : > { %9164 = vmatpush3.bf16.msra.mxu1 %v9161_v9  ;;  %8712 = vmatprep.mubr.f32.mxu1 %v4840_v16  ;;  %v7008_v9 = vsel %vm496_vm0, %v6933_v8, 0 }
 0x545   : > { %9166 = vmatprep.subr.bf16.mxu1 %v9165_v18 }
 0x54b   : > { %8713 = vmatmul.mubr.f32.vlgmr.msra.gmra.mrb[6].mxu1 %v4850_v10 }
 0x54c   : > { %9168 = vmatpush3.bf16.msra.mxu1 %v9165_v18  ;;  %8719 = vmatprep.mubr.f32.mxu1 %v4841_v13 }
 0x54d   : > { %9170 = vmatprep.subr.bf16.mxu1 %v10241_v24 }
 0x553   : > { %8720 = vmatmul.mubr.f32.vlgmr.msra.gmra.mrb[6].mxu1 %v4851_v17 }
 0x554   : > { %9172 = vmatpush3.bf16.msra.mxu1 %v10241_v24  ;;  %8726 = vmatprep.mubr.f32.mxu1 %v4842_v15  ;;  %v3702_v15 = vsel %vm2638_vm2, %v10207_v46, 0.0 }
 0x555   : > { %9174 = vmatprep.subr.bf16.mxu1 %v9173_v26 }
 0x55b   : > { %8727 = vmatmul.mubr.f32.vlgmr.msra.gmra.mrb[6].mxu1 %v4852_v14 }
 0x55c   : > { %9176 = vmatpush3.bf16.msra.mxu1 %v9173_v26  ;;  %8733 = vmatprep.mubr.f32.mxu1 %v4840_v16 }
 0x55d   : > { %9178 = vmatprep.subr.bf16.mxu1 %v10241_v24 }
 0x563   : > { %8734 = vmatmul.mubr.f32.vlgmr.msra.gmra.mrb[6].mxu1 %v4850_v10 }
 0x564   : > { %9180 = vmatpush3.bf16.msra.mxu1 %v10241_v24  ;;  %8740 = vmatprep.mubr.f32.mxu1 %v4840_v16  ;;  %v9197_v24 = vpack.c.bf16 %v5392_v54, %v5385_v55 }
 0x565   : > { %9182 = vmatprep.subr.bf16.mxu1 %v9181_v58 }
 0x56b   : > { %8741 = vmatmul.mubr.f32.vlgmr.msra.gmra.mrb[6].mxu1 %v4850_v10  ;;  %v10268_v10 = vand.u32 4294901760, %v7008_v9 }
 0x56c   : > { %8747 = vmatprep.mubr.f32.mxu1 %v5366_v0 }
 0x56d   : > { %9184 = vmatpush3.bf16.xpose.msra.mxu1 %v9181_v58  ;;  %v10271_v11 = vsub.f32 %v7008_v9, %v10268_v10 }
 0x56e   : > { %9186 = vmatprep.subr.bf16.mxu1 %v9185_v21 }
 0x574   : > { %8748 = vmatmul.mubr.f32.vlgmr.msra.gmra.mrb[8].mxu1 %v5376_v4 }
 0x575   : > { %9188 = vmatpush3.bf16.xpose.msra.mxu1 %v9185_v21  ;;  %8754 = vmatprep.mubr.f32.mxu1 %v5362_v31 }
 0x576   : > { %9190 = vmatprep.subr.bf16.mxu1 %v9189_v5 }
 0x57c   : > { %8755 = vmatmul.mubr.f32.vlgmr.msra.gmra.mrb[8].mxu1 %v5372_v56 }
 0x57d   : > { %9192 = vmatpush3.bf16.xpose.msra.mxu1 %v9189_v5  ;;  %8761 = vmatprep.mubr.f32.mxu1 %v5363_v52 }
 0x57e   : > { %9194 = vmatprep.subr.bf16.mxu1 %v9181_v58 }
 0x584   : > { %8762 = vmatmul.mubr.f32.vlgmr.msra.gmra.mrb[8].mxu1 %v5373_v60 }
 0x585   : > { %9196 = vmatpush3.bf16.xpose.msra.mxu1 %v9181_v58  ;;  %8768 = vmatprep.mubr.f32.mxu1 %v5364_v57 }
 0x586   : > { %9198 = vmatprep.subr.bf16.mxu1 %v9197_v24 }
 0x58c   : > { %8769 = vmatmul.mubr.f32.vlgmr.msra.gmra.mrb[8].mxu1 %v5374_v33 }
 0x58d   : > { %9200 = vmatpush3.bf16.xpose.msra.mxu1 %v9197_v24  ;;  %8775 = vmatprep.mubr.f32.mxu1 %v5362_v31 }
 0x58e   : > { %9202 = vmatprep.subr.bf16.mxu1 %v9181_v58 }
 0x594   : > { %8776 = vmatmul.mubr.f32.vlgmr.msra.gmra.mrb[8].mxu1 %v5372_v56 }
 0x595   : > { %9204 = vmatpush3.bf16.xpose.msra.mxu1 %v9181_v58  ;;  %8782 = vmatprep.mubr.f32.mxu1 %v5362_v31 }
 0x59c   : > { %8783 = vmatmul.mubr.f32.vlgmr.msra.gmra.mrb[8].mxu1 %v5372_v56 }
 0x59d   : > { %7436 = vmatprep.mubr.f32.mxu1 %v10271_v11 }
 0x63e   : > { %v10274_v16 = vpop.f32.mrb[6].mxu1 }
 0x63f   : > { %v10276_v17 = vpop.f32.mrb[7].mxu1 }
 0x66f   : > { %v8784_v13 = vpop.f32.mrb[8].mxu1 }
 0x670   : > { %v5787_v14 = vpop.f32.mrb[9].mxu1  ;;  %v5800_v41 = vsel %vm2638_vm2, %v8784_v13, -inf }
 0x671   : > { %5801 = vmax.xlane.f32.xlu1 %v5800_v41  ;;  %v5797_v42 = vsel %vm2638_vm2, %v5787_v14, -inf }
 0x672   : > { %5798 = vmax.xlane.f32.xlu0 %v5797_v42 }
 0x682   : > { %5817 = vrot.lane.b32.xlu1 %v10142_v27, %s9754_s23 }
 0x688   : > { %5815 = vrot.lane.b32.xlu0 %v10144_v28, %s9754_s23 }
 0x6a6   : > { %3703 = vadd.xlane.f32.xlu1 %v3702_v15 }
 0x6a7   : > { %3700 = vadd.xlane.f32.xlu0 %v3699_v22 }
 0x6ab   : > { %4756 = vadd.xlane.f32.xlu0 %v4755_v23 }
 0x6af   : > { %4759 = vadd.xlane.f32.xlu0 %v4758_v12 }
 0x6fe   : > { %v5802_v25 = vpop.xlane.xlu1 %5801 }
 0x6ff   : > { %v5804_v18 = vsub.f32 %v8784_v13, %v5802_v25  ;;  %v5799_v19 = vpop.xlane.xlu0 %5798 }
 0x700   : > { %v5803_v20 = vsub.f32 %v5787_v14, %v5799_v19 }
 0x701   : > { %v5807_v26 = vmul.f32 1.442695, %v5804_v18  ;;  %v11143_v18 = vmov 0.0|0.0  }
 0x702   : > { %v5805_v29 = vmul.f32 1.442695, %v5803_v20  ;;  %v5818_v46 = vpop.permute.xlu1 %5817  ;;  %9337 = vmatprep.subr.bf16.mxu1 %v11143_v18  ;;  %v10327_v20 = vld [vmem:[%s11121_s11 + $0x18] sm:$0xff] }
 0x703   : > { %9668 = vpow2.f32 %v5807_v26  ;;  %v5831_v30 = vand.u32 4294901760, %v5818_v46  ;;  %v5816_v35 = vpop.permute.xlu0 %5815 }
 0x704   : > { %9670 = vpow2.f32 %v5805_v29  ;;  %v5828_v38 = vand.u32 4294901760, %v5816_v35  ;;  %v10333_v29 = vld [vmem:[%s11121_s11 + $0x20] sm:$0xff] }
 0x705   : > { %v5923_v36 = vsub.f32 %v5818_v46, %v5831_v30  ;;  %v10338_v46 = vld [vmem:[%s11121_s11 + $0x28] sm:$0xff]  ;;  %v11202_v34 = vand.u32 4294901760, %v10333_v29 }
 0x706   : > { %v9205_v37 = vpack.c.bf16 %v5831_v30, %v5828_v38  ;;  %v5916_v7 = vsub.f32 %v5816_v35, %v5828_v38  ;;  %v11135_v30 = vand.u32 4294901760, %v10327_v20  ;;  %v11134_v35 = vand.u32 4294901760, %v10333_v29 }
 0x707   : > { %v5924_v39 = vand.u32 4294901760, %v5923_v36 }
 0x708   : > { %v5917_v31 = vand.u32 4294901760, %v5916_v7  ;;  %9206 = vmatprep.subr.bf16.mxu0 %v9205_v37  ;;  %v9213_v24 = vpack.c.bf16 %v5923_v36, %v5916_v7 }
 0x709   : > { %v5925_v6 = vsub.f32 %v5923_v36, %v5924_v39  ;;  %9208 = vmatpush3.bf16.msra.mxu0 %v9205_v37 }
 0x70a   : > { %v5918_v47 = vsub.f32 %v5916_v7, %v5917_v31  ;;  %v9221_v1 = vpack.c.bf16 %v5924_v39, %v5917_v31  ;;  %v11133_v7 = vand.u32 4294901760, %v10338_v46  ;;  %v10361_v39 = vld [vmem:[%s11121_s11 + $0x30] sm:$0xff]  ;;  %v10366_v31 = vsub.f32 %v10327_v20, %v11135_v30 }
 0x70b   : > { %v5926_v48 = vand.u32 4294901760, %v5925_v6  ;;  %v10371_v6 = vld [vmem:[%s11121_s11 + $0x38] sm:$0xff]  ;;  %v6366_v30 = vld [vmem:[%s11119_s9 + $0x10] sm:$0xff] }
 0x70c   : > { %v5919_v51 = vand.u32 4294901760, %v5918_v47 }
 0x70d   : > { %v9669_v52 = vpop.eup %9668 }
 0x70e   : > { %v9671_v53 = vpop.eup %9670  ;;  %v5825_v54 = vsel %vm2638_vm2, %v9669_v52, 0  ;;  %v5812_v55 = vsel %vm2638_vm2, %v9669_v52, 0.0  ;;  %v9209_v56 = vpack.c.bf16 %v5926_v48, %v5919_v51  ;;  %v11132_v48 = vand.u32 4294901760, %v10361_v39 }
 0x70f   : > { %v5904_v57 = vand.u32 4294901760, %v5825_v54  ;;  %5813 = vadd.xlane.f32.xlu0 %v5812_v55  ;;  %v5809_v58 = vsel %vm2638_vm2, %v9671_v53, 0.0  ;;  %v5822_v59 = vsel %vm2638_vm2, %v9671_v53, 0  ;;  %v10381_v52 = vsub.f32 %v10333_v29, %v11134_v35  ;;  %v10392_v55 = vld [vmem:[%s11121_s11 + $0x40] sm:$0xff] }
 0x710   : > { %5810 = vadd.xlane.f32.xlu1 %v5809_v58  ;;  %9210 = vmatprep.subr.bf16.mxu0 %v9209_v56  ;;  %v5894_v32 = vand.u32 4294901760, %v5822_v59  ;;  %v10386_v53 = vsub.f32 %v10338_v46, %v11133_v7 }
 0x711   : > { %v5905_v60 = vsub.f32 %v5825_v54, %v5904_v57  ;;  %v11131_v54 = vand.u32 4294901760, %v10371_v6 }
 0x712   : > { %v5895_v62 = vsub.f32 %v5822_v59, %v5894_v32  ;;  %v9344_v58 = vpack.c.bf16 %v10386_v53, %v10381_v52  ;;  %v10406_v59 = vsub.f32 %v10361_v39, %v11132_v48 }
 0x713   : > { %2655 = vadd.xlane.f32.xlu0 %v2654_v61  ;;  %v5906_v33 = vand.u32 4294901760, %v5905_v60  ;;  %v10418_v61 = vld [vmem:[%s11121_s11 + $0x50] sm:$0xff] }
 0x714   : > { %2652 = vadd.xlane.f32.xlu1 %v2651_v63  ;;  %v5896_v0 = vand.u32 4294901760, %v5895_v62 }
 0x715   : > { %v5907_v21 = vsub.f32 %v5905_v60, %v5906_v33 }
 0x716   : > { %v5897_v3 = vsub.f32 %v5895_v62, %v5896_v0 }
 0x717   : > { %v5908_v5 = vand.u32 4294901760, %v5907_v21  ;;  %v11128_v21 = vand.u32 4294901760, %v10418_v61 }
 0x718   : > { %v5898_v4 = vand.u32 4294901760, %v5897_v3 }
 0x71a   : > { %8789 = vmatprep.mubr.f32.mxu0 %v5898_v4  ;;  %v10442_v4 = vld [vmem:[%s11121_s11 + $0x60] sm:$0xff] }
 0x71b   : > { %8790 = vmatmul.mubr.f32.vlgmr.msra.gmra.mrb[12].mxu0 %v5908_v5  ;;  %v10448_v5 = vld [vmem:[%s11121_s11 + $0x68] sm:$0xff] }
 0x71c   : > { %9212 = vmatpush3.bf16.msra.mxu0 %v9209_v56  ;;  %8796 = vmatprep.mubr.f32.mxu0 %v5894_v32  ;;  %v10398_v56 = vld [vmem:[%s11121_s11 + $0x48] sm:$0xff] }
 0x71d   : > { %9214 = vmatprep.subr.bf16.mxu0 %v9213_v24 }
 0x723   : > { %8797 = vmatmul.mubr.f32.vlgmr.msra.gmra.mrb[12].mxu0 %v5904_v57 }
 0x724   : > { %9216 = vmatpush3.bf16.msra.mxu0 %v9213_v24  ;;  %8803 = vmatprep.mubr.f32.mxu0 %v5895_v62  ;;  %v10423_v62 = vld [vmem:[%s11121_s11 + $0x58] sm:$0xff]  ;;  %v11126_v24 = vand.u32 4294901760, %v10442_v4 }
 0x725   : > { %9218 = vmatprep.subr.bf16.mxu0 %v9205_v37  ;;  %v11127_v3 = vand.u32 4294901760, %v10423_v62 }
 0x72b   : > { %8804 = vmatmul.mubr.f32.vlgmr.msra.gmra.mrb[12].mxu0 %v5905_v60  ;;  %v11129_v60 = vand.u32 4294901760, %v10398_v56 }
 0x72c   : > { %9220 = vmatpush3.bf16.msra.mxu0 %v9205_v37  ;;  %8810 = vmatprep.mubr.f32.mxu0 %v5896_v0 }
 0x72d   : > { %9222 = vmatprep.subr.bf16.mxu0 %v9221_v1  ;;  %v10435_v0 = vsub.f32 %v10398_v56, %v11129_v60 }
 0x72f   : > { %11181 = vst [vmem:[#allocation7_spill] sm:$0xff] %v10435_v0 }
 0x733   : > { %v3704_v2 = vpop.xlane.xlu1 %3703  ;;  %8811 = vmatmul.mubr.f32.vlgmr.msra.gmra.mrb[12].mxu0 %v5906_v33 }
 0x734   : > { %9672 = vrcp.f32 %v3704_v2  ;;  %9224 = vmatpush3.bf16.msra.mxu0 %v9221_v1  ;;  %8817 = vmatprep.mubr.f32.mxu0 %v5894_v32  ;;  %v3701_v8 = vpop.xlane.xlu0 %3700  ;;  %v10456_v2 = vsub.f32 %v10418_v61, %v11128_v21 }
 0x735   : > { %9226 = vmatprep.subr.bf16.mxu0 %v9205_v37  ;;  %9674 = vrcp.f32 %v3701_v8  ;;  %v10461_v8 = vsub.f32 %v10423_v62, %v11127_v3 }
 0x736   : > { %11182 = vst [vmem:[#allocation8_spill] sm:$0xff] %v10456_v2 }
 0x737   : > { %11183 = vst [vmem:[#allocation9_spill] sm:$0xff] %v10461_v8 }
 0x738   : > { %v4757_v9 = vpop.xlane.xlu0 %4756 }
 0x739   : > { %9676 = vrcp.f32 %v4757_v9  ;;  %v11125_v9 = vand.u32 4294901760, %v10448_v5 }
 0x73b   : > { %8818 = vmatmul.mubr.f32.vlgmr.msra.gmra.mrb[12].mxu0 %v5904_v57 }
 0x73c   : > { %9228 = vmatpush3.bf16.msra.mxu0 %v9205_v37  ;;  %8824 = vmatprep.mubr.f32.mxu0 %v5894_v32  ;;  %v4760_v13 = vpop.xlane.xlu0 %4759  ;;  %v10411_v32 = vsub.f32 %v10371_v6, %v11131_v54  ;;  %v10540_v54 = vld [vmem:[%s11121_s11 + $0x90] sm:$0xff] }
 0x73d   : > { %9678 = vrcp.f32 %v4760_v13  ;;  %v9353_v13 = vpack.c.bf16 %v10461_v8, %v10456_v2 }
 0x73e   : > { %v9673_v14 = vpop.eup %9672  ;;  %v9347_v33 = vpack.c.bf16 %v10411_v32, %v10406_v59 }
 0x73f   : > { %v9675_v41 = vpop.eup %9674  ;;  %v4224_v42 = vmul.f32 %v9673_v14, %v10223_v44  ;;  %v10309_v44 = vld [vmem:[%s11121_s11] sm:$0xff]  ;;  %v10470_v14 = vsub.f32 %v10442_v4, %v11126_v24 }
 0x740   : > { %v4223_v15 = vmul.f32 %v9675_v41, %v10225_v45  ;;  %v10314_v45 = vld [vmem:[%s11121_s11 + $0x8] sm:$0xff]  ;;  %v10475_v41 = vsub.f32 %v10448_v5, %v11125_v9 }
 0x741   : > { %6337 = vrot.lane.b32.xlu0 %v4224_v42, %s11174_s24  ;;  %v11137_v19 = vand.u32 4294901760, %v10314_v45  ;;  %11184 = vst [vmem:[#allocation10_spill] sm:$0xff] %v10470_v14 }
 0x742   : > { %6335 = vrot.lane.b32.xlu1 %v4223_v15, %s11174_s24  ;;  %11185 = vst [vmem:[#allocation11_spill] sm:$0xff] %v10475_v41  ;;  %v9356_v42 = vpack.c.bf16 %v10475_v41, %v10470_v14 }
 0x743   : > { %v9677_v22 = vpop.eup %9676  ;;  %8825 = vmatmul.mubr.f32.vlgmr.msra.gmra.mrb[12].mxu0 %v5904_v57  ;;  %v10350_v36 = vsub.f32 %v10314_v45, %v11137_v19  ;;  %v11130_v57 = vand.u32 4294901760, %v10392_v55  ;;  %v11151_v19 = vand.u32 4294901760, %v10540_v54 }
 0x744   : > { %v5277_v23 = vmul.f32 %v9677_v22, %v10276_v17  ;;  %v10319_v17 = vld [vmem:[%s11121_s11 + $0x10] sm:$0xff] }
 0x745   : > { %v11136_v26 = vand.u32 4294901760, %v10319_v17  ;;  %v10428_v63 = vsub.f32 %v10392_v55, %v11130_v57 }
 0x746   : > { %6343 = vrot.lane.b32.xlu1 %v5277_v23, %s9756_s30  ;;  %v10485_v23 = vld [vmem:[%s11121_s11 + $0x70] sm:$0xff] }
 0x747   : > { %v9679_v12 = vpop.eup %9678  ;;  %v10355_v37 = vsub.f32 %v10319_v17, %v11136_v26  ;;  %v9350_v1 = vpack.c.bf16 %v10435_v0, %v10428_v63  ;;  %v6367_v26 = vld [vmem:[%s11119_s9 + $0x18] sm:$0xff] }
 0x748   : > { %v5278_v25 = vmul.f32 %v9679_v12, %v10274_v16  ;;  %v11138_v16 = vand.u32 4294901760, %v10309_v44  ;;  %v10490_v12 = vld [vmem:[%s11121_s11 + $0x78] sm:$0xff] }
 0x749   : > { %v9341_v51 = vpack.c.bf16 %v10366_v31, %v10355_v37 }
 0x74a   : > { %6345 = vrot.lane.b32.xlu1 %v5278_v25, %s9756_s30  ;;  %v10345_v38 = vsub.f32 %v10309_v44, %v11138_v16  ;;  %v11142_v25 = vand.u32 4294901760, %v10485_v23 }
 0x74c   : > { %v9338_v47 = vpack.c.bf16 %v10350_v36, %v10345_v38 }
 0x74e   : > { %9339 = vmatpush1.bf16.msra.mxu1 %v9338_v47  ;;  %v11141_v47 = vand.u32 4294901760, %v10490_v12 }
 0x74f   : > { %9340 = vmatprep.subr.bf16.mxu1 %v11143_v18 }
 0x752   : > { %9342 = vmatpush1.bf16.msra.mxu1 %v9341_v51  ;;  %v10497_v51 = vsub.f32 %v10485_v23, %v11142_v25 }
 0x753   : > { %9343 = vmatprep.subr.bf16.mxu1 %v11143_v18 }
 0x754   : > { %11186 = vst [vmem:[#allocation12_spill] sm:$0xff] %v10497_v51 }
 0x756   : > { %9345 = vmatpush1.bf16.msra.mxu1 %v9344_v58  ;;  %v10502_v58 = vsub.f32 %v10490_v12, %v11141_v47 }
 0x757   : > { %9346 = vmatprep.subr.bf16.mxu1 %v11143_v18 }
 0x758   : > { %11187 = vst [vmem:[#allocation13_spill] sm:$0xff] %v10502_v58 }
 0x75a   : > { %9348 = vmatpush1.bf16.msra.mxu1 %v9347_v33  ;;  %v10507_v33 = vld [vmem:[%s11121_s11 + $0x80] sm:$0xff] }
 0x75b   : > { %9349 = vmatprep.subr.bf16.mxu1 %v11143_v18 }
 0x75e   : > { %9351 = vmatpush1.bf16.msra.mxu1 %v9350_v1  ;;  %v10512_v1 = vld [vmem:[%s11121_s11 + $0x88] sm:$0xff] }
 0x75f   : > { %9352 = vmatprep.subr.bf16.mxu1 %v11143_v18  ;;  %v11139_v9 = vand.u32 4294901760, %v10512_v1 }
 0x761   : > { %v10532_v60 = vsub.f32 %v10512_v1, %v11139_v9 }
 0x762   : > { %9354 = vmatpush1.bf16.msra.mxu1 %v9353_v13  ;;  %v9359_v13 = vpack.c.bf16 %v10502_v58, %v10497_v51 }
 0x763   : > { %9355 = vmatprep.subr.bf16.mxu1 %v11143_v18  ;;  %11189 = vst [vmem:[#allocation15_spill] sm:$0xff] %v10532_v60 }
 0x766   : > { %9357 = vmatpush1.bf16.msra.mxu1 %v9356_v42  ;;  %v6364_v42 = vld [vmem:[%s11119_s9] sm:$0xff] }
 0x767   : > { %9358 = vmatprep.subr.bf16.mxu1 %v11143_v18  ;;  %v6382_v24 = vand.u32 4294901760, %v6364_v42 }
 0x769   : > { %v10547_v48 = vsub.f32 %v6364_v42, %v6382_v24  ;;  %v10566_v42 = vsub.f32 %v10540_v54, %v11151_v19 }
 0x76a   : > { %9360 = vmatpush1.bf16.msra.mxu1 %v9359_v13  ;;  %v10545_v13 = vld [vmem:[%s11121_s11 + $0x98] sm:$0xff] }
 0x76b   : > { %9361 = vmatprep.subr.bf16.mxu1 %v11143_v18  ;;  %v11156_v16 = vand.u32 4294901760, %v10545_v13  ;;  %v6473_v9 = vand.u32 4294901760, %v10547_v48 }
 0x79c   : > { %v5814_v15 = vpop.xlane.xlu0 %5813 }
 0x79d   : > { %v5811_v22 = vpop.xlane.xlu1 %5810  ;;  %9680 = vrcp.f32 %v5814_v15  ;;  %v6365_v15 = vld [vmem:[%s11119_s9 + $0x8] sm:$0xff] }
 0x79e   : > { %9682 = vrcp.f32 %v5811_v22  ;;  %v11140_v22 = vand.u32 4294901760, %v10507_v33  ;;  %v6385_v3 = vand.u32 4294901760, %v6365_v15 }
 0x7a0   : > { %v10527_v21 = vsub.f32 %v10507_v33, %v11140_v22  ;;  %v10534_v57 = vpack.c.bf16 %v6385_v3, %v6382_v24  ;;  %v10549_v7 = vsub.f32 %v6365_v15, %v6385_v3  ;;  %v6388_v24 = vand.u32 4294901760, %v6366_v30 }
 0x7a1   : > { %v6391_v3 = vand.u32 4294901760, %v6367_v26  ;;  %v10571_v15 = vsub.f32 %v10545_v13, %v11156_v16  ;;  %v6474_v16 = vsub.f32 %v10547_v48, %v6473_v9 }
 0x7a2   : > { %11188 = vst [vmem:[#allocation14_spill] sm:$0xff] %v10527_v21  ;;  %v9362_v35 = vpack.c.bf16 %v10532_v60, %v10527_v21  ;;  %9230 = vmatprep.subr.bf16.mxu0 %v10534_v57  ;;  %v6480_v22 = vand.u32 4294901760, %v10549_v7  ;;  %v11191_v60 = vmov 0.0|0.0  }
 0x7a3   : > { %9232 = vmatpush3.bf16.msra.mxu0 %v10534_v57  ;;  %11190 = vst [vmem:[#allocation16_spill] sm:$0xff] %v10571_v15  ;;  %v10575_v18 = vpack.c.bf16 %v6391_v3, %v6388_v24  ;;  %v6493_v21 = vsub.f32 %v6367_v26, %v6391_v3  ;;  %v9365_v41 = vpack.c.bf16 %v10571_v15, %v10566_v42  ;;  %v6475_v26 = vand.u32 4294901760, %v6474_v16 }
 0x7a4   : > { %9363 = vmatpush1.bf16.msra.mxu1 %v9362_v35  ;;  %v6486_v35 = vsub.f32 %v6366_v30, %v6388_v24  ;;  %v6481_v14 = vsub.f32 %v10549_v7, %v6480_v22  ;;  %v6917_v30 = vrot.slane %v10144_v28, 7 }
 0x7a5   : > { %9364 = vmatprep.subr.bf16.mxu1 %v11191_v60  ;;  %9234 = vmatprep.subr.bf16.mxu0 %v10575_v18  ;;  %v6494_v0 = vand.u32 4294901760, %v6493_v21 }
 0x7a6   : > { %v6487_v2 = vand.u32 4294901760, %v6486_v35  ;;  %v6922_v16 = vsel %vm6919_vm4, 0.0, %v6917_v30 }
 0x7a7   : > { %v9681_v47 = vpop.eup %9680  ;;  %9236 = vmatpush3.bf16.msra.mxu0 %v10575_v18  ;;  %v6495_v24 = vsub.f32 %v6493_v21, %v6494_v0 }
 0x7a8   : > { %v9683_v58 = vpop.eup %9682  ;;  %9366 = vmatpush1.bf16.msra.mxu1 %v9365_v41 }
 0x7a9   : > { %9367 = vmatprep.subr.bf16.mxu1 %v11191_v60 }
 0x816   : > { %v8826_v25 = vpop.f32.mrb[12].mxu0 }
 0x817   : > { %v6332_v19 = vmul.f32 %v9681_v47, %v8826_v25  ;;  %v6319_v51 = vpop.f32.mrb[13].mxu0  ;;  %v6482_v25 = vand.u32 4294901760, %v6481_v14  ;;  %v6488_v47 = vsub.f32 %v6486_v35, %v6487_v2  ;;  %v6924_v14 = vrot.slane %v10142_v27, 1 }
 0x818   : > { %v6331_v8 = vmul.f32 %v9683_v58, %v6319_v51  ;;  %v6918_v51 = vrot.slane %v10142_v27, 7 }
 0x819   : > { %6353 = vrot.lane.b32.xlu1 %v6332_v19, %s9758_s20  ;;  %v10586_v3 = vpack.c.bf16 %v6482_v25, %v6475_v26  ;;  %v6489_v58 = vand.u32 4294901760, %v6488_v47  ;;  %v6496_v19 = vand.u32 4294901760, %v6495_v24  ;;  %v10605_v47 = vpack.c.bf16 %v10549_v7, %v10547_v48 }
 0x81a   : > { %6351 = vrot.lane.b32.xlu0 %v6331_v8, %s9758_s20  ;;  %v6923_v8 = vrot.slane %v10144_v28, 1  ;;  %v6921_v26 = vsel %vm6919_vm4, %v6917_v30, %v6918_v51  ;;  %v6926_v24 = vsel %vm6925_vm5, %v6924_v14, 0.0  ;;  %v6920_v30 = vsel %vm6919_vm4, %v6918_v51, 0.0  ;;  %s7936_s20 = sshll.u32 %s461_s27, 4 }
 0x81b   : > { %9238 = vmatprep.subr.bf16.mxu0 %v10586_v3  ;;  %v10597_v41 = vpack.c.bf16 %v6496_v19, %v6489_v58  ;;  %v9762_v58 = vmov 0.0   ;;  %v10616_v7 = vpack.c.bf16 %v6480_v22, %v6473_v9  ;;  %v10618_v48 = vpack.c.bf16 %v6494_v0, %v6487_v2  ;;  %v2653_v0 = vpop.xlane.xlu1 %2652  ;;  %v2656_v2 = vpop.xlane.xlu0 %2655 }
 0x81c   : > { %v6927_v25 = vsel %vm6925_vm5, %v6923_v8, %v6924_v14  ;;  %v6928_v19 = vsel %vm6925_vm5, 0.0, %v6923_v8  ;;  %v11195_v51 = vand.u32 4294901760, %v10512_v1  ;;  %v11197_v8 = vand.u32 4294901760, %v10545_v13 }
 0x81d   : > { %6948 = vrot.lane.b32.xlu1 %v10144_v28, %s9759_s21  ;;  %9684 = vrcp.f32 %v2656_v2 }
 0x81e   : > { %6938 = vrot.lane.b32.xlu0 %v6922_v16, %s9760_s17  ;;  %v10609_v16 = vpack.c.bf16 %v6493_v21, %v6486_v35  ;;  %v11192_v21 = vand.u32 4294901760, %v10485_v23  ;;  %v11193_v35 = vand.u32 4294901760, %v10490_v12  ;;  %9686 = vrcp.f32 %v2653_v0 }
 0x81f   : > { %v6336_v23 = vpop.permute.xlu1 %6335 }
 0x820   : > { %v10624_v14 = vpack.c.bf16 %v11193_v35, %v11192_v21 }
 0x821   : > { %6940 = vrot.lane.b32.xlu1 %v6921_v26, %s9760_s17  ;;  %v11194_v26 = vand.u32 4294901760, %v10507_v33 }
 0x822   : > { %6960 = vrot.lane.b32.xlu0 %v6927_v25, %s9761_s22 }
 0x823   : > { %v10630_v25 = vpack.c.bf16 %v11195_v51, %v11194_v26  ;;  %v6344_v12 = vpop.permute.xlu1 %6343 }
 0x825   : > { %6962 = vrot.lane.b32.xlu1 %v6926_v24, %s9761_s22  ;;  %v11196_v24 = vand.u32 4294901760, %v10540_v54 }
 0x826   : > { %6950 = vrot.lane.b32.xlu0 %v10142_v27, %s9759_s21 }
 0x827   : > { %v10636_v9 = vpack.c.bf16 %v11197_v8, %v11196_v24  ;;  %v9685_v22 = vpop.eup %9684  ;;  %v6346_v33 = vpop.permute.xlu1 %6345  ;;  %v6909_v8 = vrot.slane %v10144_v28, 6 }
 0x828   : > { %v3168_v1 = vmul.f32 %v9685_v22, %v10219_v40 }
 0x829   : > { %6952 = vrot.lane.b32.xlu1 %v9762_v58, %s9759_s21  ;;  %v6338_v58 = vpop.permute.xlu0 %6337  ;;  %s463_s21 = scalar_lea.vmem [#allocation2], %s7936_s20  ;;  %s9763_s20 = smov [#allocation2]  }
 0x82a   : > { %6942 = vrot.lane.b32.xlu0 %v6920_v30, %s9760_s17  ;;  %v9687_v30 = vpop.eup %9686  ;;  %v6358_v54 = vsel %vm2123_vm1, %v3168_v1, %v6338_v58  ;;  %s7846_s17 = sshll.u32 %s463_s21, 4  ;;  %s9692_s24 = sshll.u32 %s9763_s20, 4  ;;  %s11058_s17 = int_to_ptr.vmem [resolvable:$true] %s7846_s17  ;;  %s9693_s24 = int_to_ptr.vmem [resolvable:$false] %s9692_s24 }
 0x82b   : > { %v6360_v21 = vsel %vm2638_vm2, %v6358_v54, %v6346_v33  ;;  %s9688_s16 = scalar_lea.vmem %s11058_s17, 256  ;;  %s9694_s0 = scalar_lea.vmem %s9693_s24, 512 }
 0x82c   : > { %p9689_p11 = scmp.ne.s32.totalorder %s11058_s17, %s9688_s16  ;;  %p9695_p0 = scmp.lt.s32.totalorder %s11058_s17, %s9693_s24 }
 0x82d   : > { %p9696_p1 = scmp.lt.s32.totalorder %s9694_s0, %s9688_s16 }
 0x82e   : > { %6964 = vrot.lane.b32.xlu0 %v6928_v19, %s9761_s22  ;;  %v3167_v19 = vmul.f32 %v9687_v30, %v10221_v43  ;;  %s7956_s22 = sshll.u32 %s9856_s29, 8  ;;  %s11068_s29 = scalar_lea.sflag [#allocation3], %s461_s27 }
 0x82f   : > { %s11063_s15 = scalar_lea.hbm %s11123_s13, %s7956_s22  ;;  %p9690_p12 = pnand %p9689_p11, %p9873_p5 }
 0x830   : > { %v6357_v13 = vsel %vm2123_vm1, %v3167_v19, %v6336_v23  ;;  %v6910_v19 = vrot.slane %v10142_v27, 6  ;;  %p9697_p2 = por %p9696_p1, %p9695_p0 }
 0x831   : > { %v6359_v26 = vsel %vm2638_vm2, %v6357_v13, %v6344_v12  ;;  %v6916_v12 = vsel %vm6913_vm7, 0.0, %v6909_v8  ;;  %p9691_p13 = pneg %p9690_p12 }
 0x833   : > { %p9698_p3 = pnand %p9697_p2, %p9691_p13 }
 0x88b   : > { %v6354_v35 = vpop.permute.xlu1 %6353 }
 0x88c   : > { %v6363_v51 = vsel %vm6361_vm6, %v6360_v21, %v6354_v35  ;;  %v6352_v24 = vpop.permute.xlu0 %6351  ;;  %v7011_v21 = vsel %vm496_vm0, %v10165_v49, 0  ;;  %v6915_v49 = vsel %vm6913_vm7, %v6909_v8, %v6910_v19 }
 0x88d   : > { %v6379_v0 = vsel %vm496_vm0, %v6363_v51, 0  ;;  %v6362_v2 = vsel %vm6361_vm6, %v6359_v26, %v6352_v24 }
 0x88e   : > { %v10647_v40 = vand.u32 4294901760, %v6379_v0  ;;  %v6376_v43 = vsel %vm496_vm0, %v6362_v2, 0  ;;  %v10676_v2 = vand.u32 4294901760, %v7011_v21 }
 0x88f   : > { %v10650_v22 = vand.u32 4294901760, %v6376_v43  ;;  %v6949_v23 = vpop.permute.xlu1 %6948 }
 0x890   : > { %v10653_v30 = vsub.f32 %v6379_v0, %v10647_v40  ;;  %v6939_v58 = vpop.permute.xlu0 %6938 }
 0x891   : > { %v10658_v28 = vsub.f32 %v6376_v43, %v10650_v22  ;;  %v6969_v33 = vsel %vm496_vm0, %v6916_v12, %v6939_v58  ;;  %v11199_v12 = vand.u32 4294901760, %v10314_v45 }
 0x892   : > { %v11165_v1 = vand.u32 4294901760, %v10653_v30  ;;  %v6973_v35 = vsel %vm6972_vm8, %v6969_v33, %v6949_v23  ;;  %v11198_v23 = vand.u32 4294901760, %v10309_v44 }
 0x893   : > { %v6941_v54 = vpop.permute.xlu1 %6940  ;;  %v11166_v13 = vand.u32 4294901760, %v10658_v28 }
 0x894   : > { %v6961_v26 = vpop.permute.xlu0 %6960  ;;  %v6463_v51 = vsub.f32 %v10653_v30, %v11165_v1  ;;  %v10684_v58 = vpack.c.bf16 %v11199_v12, %v11198_v23  ;;  %v6970_v33 = vsel %vm496_vm0, %v6915_v49, %v6941_v54  ;;  %v10697_v54 = vsub.f32 %v7011_v21, %v10676_v2 }
 0x895   : > { %v6977_v24 = vsel %vm6976_vm9, %v6973_v35, %v6961_v26  ;;  %v6453_v0 = vsub.f32 %v10658_v28, %v11166_v13  ;;  %v7014_v13 = vsel %vm496_vm0, %v10171_v50, 0  ;;  %v11200_v50 = vand.u32 4294901760, %v10319_v17 }
 0x896   : > { %v10674_v27 = vand.u32 4294901760, %v6977_v24  ;;  %v6464_v1 = vand.u32 4294901760, %v6463_v51  ;;  %v11201_v51 = vand.u32 4294901760, %v10327_v20  ;;  %v10709_v49 = vand.u32 4294901760, %v7014_v13 }
 0x897   : > { %v6454_v43 = vand.u32 4294901760, %v6453_v0  ;;  %v6963_v15 = vpop.permute.xlu1 %6962 }
 0x898   : > { %v10688_v35 = vsub.f32 %v6977_v24, %v10674_v27  ;;  %v6951_v26 = vpop.permute.xlu0 %6950  ;;  %v10707_v0 = vpack.c.bf16 %v11201_v51, %v11200_v50 }
 0x899   : > { %v6974_v8 = vsel %vm6972_vm8, %v6970_v33, %v6951_v26  ;;  %8835 = vmatprep.mubr.f32.mxu0 %v6454_v43  ;;  %v10729_v43 = vsub.f32 %v7014_v13, %v10709_v49  ;;  %v11204_v13 = vand.u32 4294901760, %v10361_v39  ;;  %v11206_v39 = vand.u32 4294901760, %v10392_v55 }
 0x89a   : > { %v7108_v44 = vand.u32 4294901760, %v10688_v35  ;;  %v6978_v45 = vsel %vm6976_vm9, %v6974_v8, %v6963_v15  ;;  %8836 = vmatmul.mubr.f32.vlgmr.msra.gmra.mrb[14].mxu0 %v6464_v1  ;;  %7439 = vmatmul.mubr.f32.vlgmr.msra.gmra.mrb[10].mxu1 %v10688_v35  ;;  %v11205_v8 = vand.u32 4294901760, %v10371_v6  ;;  %v11207_v6 = vand.u32 4294901760, %v10398_v56 }
 0x89b   : > { %v10699_v24 = vand.u32 4294901760, %v6978_v45  ;;  %9240 = vmatpush3.bf16.msra.mxu0 %v10586_v3  ;;  %9369 = vmatpush1.bf16.msra.mxu1 %v10684_v58  ;;  %v6914_v3 = vsel %vm6913_vm7, %v6910_v19, 0.0  ;;  %v6953_v20 = vpop.permute.xlu1 %6952  ;;  %v11203_v19 = vand.u32 4294901760, %v10338_v46  ;;  %v11208_v55 = vand.u32 4294901760, %v10418_v61 }
 0x89c   : > { %v10714_v15 = vsub.f32 %v10688_v35, %v7108_v44  ;;  %8846 = vmatprep.mubr.f32.mxu0 %v10650_v22  ;;  %7445 = vmatprep.mubr.f32.mxu1 %v10697_v54  ;;  %v6943_v1 = vpop.permute.xlu0 %6942  ;;  %v11209_v56 = vand.u32 4294901760, %v10423_v62  ;;  %v11213_v62 = vand.u32 4294901760, %v10653_v30  ;;  %v7183_v35 = vand.u32 4294901760, %v10386_v53 }
 0x89d   : > { %v6971_v17 = vsel %vm496_vm0, %v6914_v3, %v6943_v1  ;;  %9242 = vmatprep.subr.bf16.mxu0 %v10597_v41  ;;  %9370 = vmatprep.subr.bf16.mxu1 %v11191_v60  ;;  %v10724_v21 = vsub.f32 %v6978_v45, %v10699_v24  ;;  %v10735_v23 = vpack.c.bf16 %v11203_v19, %v11202_v34  ;;  %v11212_v34 = vand.u32 4294901760, %v10448_v5 }
 0x89e   : > { %v6975_v33 = vsel %vm6972_vm8, %v6971_v17, %v6953_v20  ;;  %v10758_v45 = vpack.c.bf16 %v11205_v8, %v11204_v13  ;;  %v10775_v3 = vpack.c.bf16 %v11207_v6, %v11206_v39  ;;  %v11210_v17 = vand.u32 4294901760, %v10658_v28  ;;  %v11215_v8 = vld [vmem:[#allocation8_spill] sm:$0xff]  ;;  %v11217_v6 = vld [vmem:[#allocation10_spill] sm:$0xff] }
 0x89f   : > { %9244 = vmatpush3.bf16.msra.mxu0 %v10597_v41  ;;  %9372 = vmatpush1.bf16.msra.mxu1 %v10707_v0  ;;  %v7123_v12 = vand.u32 4294901760, %v10724_v21  ;;  %v11211_v20 = vand.u32 4294901760, %v10442_v4  ;;  %v7148_v4 = vand.u32 4294901760, %v10345_v38  ;;  %v7155_v5 = vand.u32 4294901760, %v10350_v36 }
 0x8a0   : > { %7448 = vmatmul.mubr.f32.gmra.mrb[12].mxu1 %v10724_v21  ;;  %v6965_v26 = vpop.permute.xlu0 %6964  ;;  %9246 = vmatprep.subr.bf16.mxu0 %v10605_v47  ;;  %v7190_v19 = vand.u32 4294901760, %v10406_v59 }
 0x8a1   : > { %7454 = vmatprep.mubr.f32.mxu1 %v10729_v43  ;;  %v6979_v41 = vsel %vm6976_vm9, %v6975_v33, %v6965_v26  ;;  %9373 = vmatprep.subr.bf16.mxu1 %v11191_v60  ;;  %v10747_v29 = vsub.f32 %v10724_v21, %v7123_v12  ;;  %v10803_v61 = vpack.c.bf16 %v11212_v34, %v11211_v20  ;;  %v7197_v33 = vand.u32 4294901760, %v10411_v32  ;;  %v11214_v26 = vld [vmem:[#allocation7_spill] sm:$0xff]  ;;  %v11219_v34 = vld [vmem:[#allocation12_spill] sm:$0xff] }
 0x8a2   : > { %v10749_v46 = vand.u32 4294901760, %v6979_v41  ;;  %8847 = vmatmul.mubr.f32.vlgmr.msra.gmra.mrb[14].mxu0 %v10647_v40 }
 0x8a3   : > { %9248 = vmatpush3.bf16.msra.mxu0 %v10605_v47  ;;  %9375 = vmatpush1.bf16.msra.mxu1 %v10735_v23  ;;  %v7102_v47 = vand.u32 4294901760, %v10271_v11  ;;  %v9407_v21 = vpack.c.bf16 %v7197_v33, %v7190_v19 }
 0x8a4   : > { %v10761_v50 = vsub.f32 %v6979_v41, %v10749_v46  ;;  %8857 = vmatprep.mubr.f32.mxu0 %v10658_v28  ;;  %9250 = vmatprep.subr.bf16.mxu0 %v10609_v16  ;;  %v7176_v28 = vand.u32 4294901760, %v10381_v52  ;;  %v7211_v41 = vand.u32 4294901760, %v11214_v26 }
 0x8a5   : > { %9376 = vmatprep.subr.bf16.mxu1 %v11191_v60 }
 0x8a6   : > { %7457 = vmatmul.mubr.f32.gmra.mrb[14].mxu1 %v10761_v50  ;;  %v7138_v51 = vand.u32 4294901760, %v10761_v50 }
 0x8a7   : > { %9252 = vmatpush3.bf16.msra.mxu0 %v10609_v16  ;;  %9378 = vmatpush1.bf16.msra.mxu1 %v10758_v45  ;;  %v10791_v16 = vpack.c.bf16 %v11209_v56, %v11208_v55  ;;  %v11170_v55 = vand.u32 4294901760, %v11217_v6  ;;  %v11218_v56 = vld [vmem:[#allocation11_spill] sm:$0xff] }
 0x8a8   : > { %7548 = vmatprep.mubr.f32.mxu1 %v7102_v47  ;;  %9254 = vmatprep.subr.bf16.mxu0 %v10534_v57  ;;  %v10781_v1 = vsub.f32 %v10761_v50, %v7138_v51  ;;  %v7218_v50 = vand.u32 4294901760, %v11215_v8 }
 0x8a9   : > { %9379 = vmatprep.subr.bf16.mxu1 %v11191_v60 }
 0x8aa   : > { %8858 = vmatmul.mubr.f32.vlgmr.msra.gmra.mrb[14].mxu0 %v10653_v30  ;;  %v7117_v30 = vand.u32 4294901760, %v10697_v54 }
 0x8ab   : > { %9256 = vmatpush3.bf16.msra.mxu0 %v10534_v57  ;;  %9381 = vmatpush1.bf16.msra.mxu1 %v10775_v3 }
 0x8ac   : > { %8868 = vmatprep.mubr.f32.mxu0 %v11210_v17  ;;  %9258 = vmatprep.subr.bf16.mxu0 %v10575_v18  ;;  %v11169_v17 = vand.u32 4294901760, %v11218_v56 }
 0x8ad   : > { %9382 = vmatprep.subr.bf16.mxu1 %v11191_v60 }
 0x8ae   : > { %v9416_v20 = vpack.c.bf16 %v11169_v17, %v11170_v55  ;;  %v11223_v17 = vld [vmem:[#allocation16_spill] sm:$0xff] }
 0x8af   : > { %9260 = vmatpush3.bf16.msra.mxu0 %v10575_v18  ;;  %9384 = vmatpush1.bf16.msra.mxu1 %v10791_v16  ;;  %v7281_v55 = vand.u32 4294901760, %v11223_v17 }
 0x8b0   : > { %9262 = vmatprep.subr.bf16.mxu0 %v10616_v7  ;;  %9385 = vmatprep.subr.bf16.mxu1 %v11191_v60 }
 0x8b2   : > { %8869 = vmatmul.mubr.f32.vlgmr.msra.gmra.mrb[14].mxu0 %v11213_v62  ;;  %v11172_v62 = vand.u32 4294901760, %v11219_v34 }
 0x8b3   : > { %9264 = vmatpush3.bf16.msra.mxu0 %v10616_v7  ;;  %9387 = vmatpush1.bf16.msra.mxu1 %v10803_v61  ;;  %v7103_v7 = vsub.f32 %v10271_v11, %v7102_v47  ;;  %v11216_v47 = vld [vmem:[#allocation9_spill] sm:$0xff] }
 0x8b4   : > { %8879 = vmatprep.mubr.f32.mxu0 %v10650_v22  ;;  %9266 = vmatprep.subr.bf16.mxu0 %v10618_v48 }
 0x8b5   : > { %9388 = vmatprep.subr.bf16.mxu1 %v11191_v60  ;;  %v7104_v11 = vand.u32 4294901760, %v7103_v7  ;;  %v11220_v7 = vld [vmem:[#allocation13_spill] sm:$0xff] }
 0x8b7   : > { %9268 = vmatpush3.bf16.msra.mxu0 %v10618_v48  ;;  %9390 = vmatpush1.bf16.msra.mxu1 %v10624_v14  ;;  %v7162_v48 = vand.u32 4294901760, %v10355_v37 }
 0x8b8   : > { %9270 = vmatprep.subr.bf16.mxu0 %v10534_v57  ;;  %9391 = vmatprep.subr.bf16.mxu1 %v11191_v60 }
 0x8ba   : > { %8880 = vmatmul.mubr.f32.vlgmr.msra.gmra.mrb[14].mxu0 %v10647_v40 }
 0x8bb   : > { %9272 = vmatpush3.bf16.msra.mxu0 %v10534_v57  ;;  %9393 = vmatpush1.bf16.msra.mxu1 %v10630_v25  ;;  %v9398_v57 = vpack.c.bf16 %v7155_v5, %v7148_v4 }
 0x8bc   : > { %8890 = vmatprep.mubr.f32.mxu0 %v10650_v22  ;;  %9274 = vmatprep.subr.bf16.mxu0 %v10575_v18  ;;  %v7169_v22 = vand.u32 4294901760, %v10366_v31 }
 0x8bd   : > { %9394 = vmatprep.subr.bf16.mxu1 %v11191_v60 }
 0x8bf   : > { %9276 = vmatpush3.bf16.msra.mxu0 %v10575_v18  ;;  %9396 = vmatpush1.bf16.msra.mxu1 %v10636_v9  ;;  %v9401_v18 = vpack.c.bf16 %v7169_v22, %v7162_v48 }
 0x8c0   : > { %9277 = vmatprep.subr.bf16.mxu0 %v11191_v60  ;;  %9397 = vmatprep.subr.bf16.mxu1 %v11191_v60 }
 0x8c2   : > { %7552 = vmatmul.mubr.f32.vlgmr.msra.gmra.mrb[10].mxu1 %v7108_v44  ;;  %8891 = vmatmul.mubr.f32.vlgmr.msra.gmra.mrb[14].mxu0 %v10647_v40  ;;  %v7132_v40 = vand.u32 4294901760, %v10729_v43  ;;  %v9404_v44 = vpack.c.bf16 %v7183_v35, %v7176_v28 }
 0x8c3   : > { %9279 = vmatpush1.bf16.msra.mxu0 %v10684_v58  ;;  %7559 = vmatprep.mubr.f32.mxu1 %v7117_v30 }
 0x8c4   : > { %9399 = vmatpush1.bf16.msra.mxu1 %v9398_v57  ;;  %7105 = vmatprep.mubr.f32.mxu0 %v7104_v11  ;;  %v11171_v57 = vand.u32 4294901760, %v11220_v7  ;;  %v11221_v11 = vld [vmem:[#allocation14_spill] sm:$0xff] }
 0x8c5   : > { %9280 = vmatprep.subr.bf16.mxu0 %v11191_v60  ;;  %9400 = vmatprep.subr.bf16.mxu1 %v11191_v60 }
 0x8c6   : > { %7563 = vmatmul.mubr.f32.gmra.mrb[12].mxu1 %v7123_v12  ;;  %v7204_v12 = vand.u32 4294901760, %v10428_v63 }
 0x8c7   : > { %9282 = vmatpush1.bf16.msra.mxu0 %v10707_v0  ;;  %7570 = vmatprep.mubr.f32.mxu1 %v7132_v40 }
 0x8c8   : > { %9402 = vmatpush1.bf16.msra.mxu1 %v9401_v18  ;;  %9283 = vmatprep.subr.bf16.mxu0 %v11191_v60  ;;  %v9410_v13 = vpack.c.bf16 %v7211_v41, %v7204_v12  ;;  %v7260_v18 = vand.u32 4294901760, %v11221_v11 }
 0x8c9   : > { %9403 = vmatprep.subr.bf16.mxu1 %v11191_v60 }
 0x8ca   : > { %7574 = vmatmul.mubr.f32.gmra.mrb[16].mxu1 %v7138_v51  ;;  %v7225_v51 = vand.u32 4294901760, %v11216_v47 }
 0x8cb   : > { %9285 = vmatpush1.bf16.msra.mxu0 %v10735_v23  ;;  %7703 = vmatprep.mubr.f32.mxu1 %v10268_v10 }
 0x8cc   : > { %9405 = vmatpush1.bf16.msra.mxu1 %v9404_v44  ;;  %9286 = vmatprep.subr.bf16.mxu0 %v11191_v60  ;;  %v9413_v39 = vpack.c.bf16 %v7225_v51, %v7218_v50  ;;  %v11222_v44 = vld [vmem:[#allocation15_spill] sm:$0xff] }
 0x8cd   : > { %9406 = vmatprep.subr.bf16.mxu1 %v11191_v60 }
 0x8cf   : > { %9288 = vmatpush1.bf16.msra.mxu0 %v10758_v45 }
 0x8d0   : > { %9408 = vmatpush1.bf16.msra.mxu1 %v9407_v21  ;;  %9289 = vmatprep.subr.bf16.mxu0 %v11191_v60  ;;  %v11173_v21 = vand.u32 4294901760, %v11222_v44 }
 0x8d1   : > { %9409 = vmatprep.subr.bf16.mxu1 %v11191_v60 }
 0x8d3   : > { %9291 = vmatpush1.bf16.msra.mxu0 %v10775_v3 }
 0x8d4   : > { %9411 = vmatpush1.bf16.msra.mxu1 %v9410_v13  ;;  %9292 = vmatprep.subr.bf16.mxu0 %v11191_v60  ;;  %v9419_v13 = vpack.c.bf16 %v11171_v57, %v11172_v62  ;;  %v7149_v57 = vsub.f32 %v10345_v38, %v7148_v4  ;;  %v7156_v62 = vsub.f32 %v10350_v36, %v7155_v5 }
 0x8d5   : > { %9412 = vmatprep.subr.bf16.mxu1 %v11191_v60 }
 0x8d6   : > { %v7150_v36 = vand.u32 4294901760, %v7149_v57  ;;  %v7157_v4 = vand.u32 4294901760, %v7156_v62  ;;  %v7184_v57 = vsub.f32 %v10386_v53, %v7183_v35  ;;  %v7191_v53 = vsub.f32 %v10406_v59, %v7190_v19 }
 0x8d7   : > { %9294 = vmatpush1.bf16.msra.mxu0 %v10791_v16  ;;  %v7212_v59 = vsub.f32 %v11214_v26, %v7211_v41 }
 0x8d8   : > { %9414 = vmatpush1.bf16.msra.mxu1 %v9413_v39  ;;  %9295 = vmatprep.subr.bf16.mxu0 %v11191_v60  ;;  %v9422_v39 = vpack.c.bf16 %v11173_v21, %v7260_v18  ;;  %v7170_v21 = vsub.f32 %v10366_v31, %v7169_v22  ;;  %v7110_v22 = vand.u32 4294901760, %v10714_v15  ;;  %v9308_v62 = vpack.c.bf16 %v7157_v4, %v7150_v36 }
 0x8d9   : > { %9415 = vmatprep.subr.bf16.mxu1 %v11191_v60 }
 0x8da   : > { %v7171_v31 = vand.u32 4294901760, %v7170_v21  ;;  %v7185_v21 = vand.u32 4294901760, %v7184_v57 }
 0x8db   : > { %9297 = vmatpush1.bf16.msra.mxu0 %v10803_v61 }
 0x8dc   : > { %9417 = vmatpush1.bf16.msra.mxu1 %v9416_v20  ;;  %9298 = vmatprep.subr.bf16.mxu0 %v11191_v60  ;;  %v7274_v20 = vand.u32 4294901760, %v10566_v42 }
 0x8dd   : > { %9418 = vmatprep.subr.bf16.mxu1 %v11191_v60 }
 0x8de   : > { %v9425_v38 = vpack.c.bf16 %v7281_v55, %v7274_v20 }
 0x8df   : > { %9300 = vmatpush1.bf16.msra.mxu0 %v10624_v14 }
 0x8e0   : > { %9420 = vmatpush1.bf16.msra.mxu1 %v9419_v13  ;;  %9301 = vmatprep.subr.bf16.mxu0 %v11191_v60  ;;  %v7163_v13 = vsub.f32 %v10355_v37, %v7162_v48  ;;  %v7118_v37 = vsub.f32 %v10697_v54, %v7117_v30  ;;  %v7177_v48 = vsub.f32 %v10381_v52, %v7176_v28  ;;  %v7125_v28 = vand.u32 4294901760, %v10747_v29 }
 0x8e1   : > { %9421 = vmatprep.subr.bf16.mxu1 %v11191_v60  ;;  %v7133_v30 = vsub.f32 %v10729_v43, %v7132_v40  ;;  %v7198_v43 = vsub.f32 %v10411_v32, %v7197_v33  ;;  %v7205_v29 = vsub.f32 %v10428_v63, %v7204_v12  ;;  %v7140_v32 = vand.u32 4294901760, %v10781_v1 }
 0x8e2   : > { %v7164_v5 = vand.u32 4294901760, %v7163_v13  ;;  %v7119_v54 = vand.u32 4294901760, %v7118_v37  ;;  %v7178_v15 = vand.u32 4294901760, %v7177_v48  ;;  %v7192_v40 = vand.u32 4294901760, %v7191_v53 }
 0x8e3   : > { %9303 = vmatpush1.bf16.msra.mxu0 %v10630_v25  ;;  %v7134_v35 = vand.u32 4294901760, %v7133_v30  ;;  %v7199_v19 = vand.u32 4294901760, %v7198_v43  ;;  %v7206_v63 = vand.u32 4294901760, %v7205_v29  ;;  %v7213_v33 = vand.u32 4294901760, %v7212_v59 }
 0x8e4   : > { %9423 = vmatpush1.bf16.msra.mxu1 %v9422_v39  ;;  %9304 = vmatprep.subr.bf16.mxu0 %v11191_v60  ;;  %v9311_v52 = vpack.c.bf16 %v7171_v31, %v7164_v5  ;;  %v7219_v12 = vsub.f32 %v11215_v8, %v7218_v50  ;;  %v11225_v8 = vand.u32 4294901760, %v11218_v56 }
 0x8e5   : > { %9424 = vmatprep.subr.bf16.mxu1 %v11191_v60  ;;  %v9317_v1 = vpack.c.bf16 %v7199_v19, %v7192_v40  ;;  %v9320_v26 = vpack.c.bf16 %v7213_v33, %v7206_v63 }
 0x8e6   : > { %v7220_v41 = vand.u32 4294901760, %v7219_v12  ;;  %v7240_v50 = vsub.f32 %v11218_v56, %v11225_v8 }
 0x8e7   : > { %9306 = vmatpush1.bf16.msra.mxu0 %v10636_v9 }
 0x8e8   : > { %9426 = vmatpush1.bf16.msra.mxu1 %v9425_v38  ;;  %9307 = vmatprep.subr.bf16.mxu0 %v11191_v60  ;;  %v7241_v4 = vand.u32 4294901760, %v7240_v50 }
 0x8e9   : > { %9427 = vmatprep.subr.bf16.mxu1 %v11191_v60 }
 0x8ea   : > { %7111 = vmatmul.mubr.f32.vlgmr.msra.gmra.mrb[16].mxu0 %v7110_v22  ;;  %v7275_v22 = vsub.f32 %v10566_v42, %v7274_v20  ;;  %v7947_v20 = vld [vmem:[%s11122_s12] ss:$0 sm:$0xff] }
 0x8eb   : > { %7705 = vmatmul.mubr.f32.vlgmr.msra.gmra.mrb[10].mxu1 %v10674_v27  ;;  %7120 = vmatprep.mubr.f32.mxu0 %v7119_v54 }
 0x8ec   : > { %9309 = vmatpush1.bf16.msra.mxu0 %v9308_v62  ;;  %7710 = vmatprep.mubr.f32.mxu1 %v10676_v2 }
 0x8ed   : > { %9429 = vmatpush1.bf16.msra.mxu1 %v10684_v58  ;;  %9310 = vmatprep.subr.bf16.mxu0 %v11191_v60  ;;  %v9314_v58 = vpack.c.bf16 %v7185_v21, %v7178_v15 }
 0x8ee   : > { %7126 = vmatmul.mubr.f32.gmra.mrb[18].mxu0 %v7125_v28  ;;  %9430 = vmatprep.subr.bf16.mxu1 %v11191_v60 }
 0x8ef   : > { %7712 = vmatmul.mubr.f32.gmra.mrb[12].mxu1 %v10699_v24  ;;  %7135 = vmatprep.mubr.f32.mxu0 %v7134_v35 }
 0x8f0   : > { %9312 = vmatpush1.bf16.msra.mxu0 %v9311_v52  ;;  %7717 = vmatprep.mubr.f32.mxu1 %v10709_v49 }
 0x8f1   : > { %9432 = vmatpush1.bf16.msra.mxu1 %v10707_v0  ;;  %9313 = vmatprep.subr.bf16.mxu0 %v11191_v60  ;;  %v7226_v0 = vsub.f32 %v11216_v47, %v7225_v51  ;;  %v11227_v51 = vand.u32 4294901760, %v11220_v7 }
 0x8f2   : > { %7141 = vmatmul.mubr.f32.gmra.mrb[20].mxu0 %v7140_v32  ;;  %9433 = vmatprep.subr.bf16.mxu1 %v11191_v60 }
 0x8f3   : > { %7719 = vmatmul.mubr.f32.gmra.mrb[18].mxu1 %v10749_v46  ;;  %7310 = vmatprep.mubr.f32.mxu0 %v10268_v10  ;;  %v7227_v39 = vand.u32 4294901760, %v7226_v0  ;;  %v7254_v38 = vsub.f32 %v11220_v7, %v11227_v51  ;;  %v11228_v7 = vand.u32 4294901760, %v11222_v44 }
 0x8f4   : > { %9315 = vmatpush1.bf16.msra.mxu0 %v9314_v58  ;;  %7808 = vmatprep.mubr.f32.mxu1 %v10268_v10  ;;  %v11224_v10 = vand.u32 4294901760, %v11217_v6 }
 0x8f5   : > { %9435 = vmatpush1.bf16.msra.mxu1 %v10735_v23  ;;  %9316 = vmatprep.subr.bf16.mxu0 %v11191_v60  ;;  %v11226_v23 = vand.u32 4294901760, %v11219_v34  ;;  %v7255_v56 = vand.u32 4294901760, %v7254_v38  ;;  %v7268_v5 = vsub.f32 %v11222_v44, %v11228_v7 }
 0x8f6   : > { %9436 = vmatprep.subr.bf16.mxu1 %v11191_v60  ;;  %v7233_v13 = vsub.f32 %v11217_v6, %v11224_v10  ;;  %v9323_v6 = vpack.c.bf16 %v7227_v39, %v7220_v41 }
 0x8f7   : > { %v7247_v47 = vsub.f32 %v11219_v34, %v11226_v23  ;;  %v7261_v34 = vsub.f32 %v11221_v11, %v7260_v18  ;;  %v7269_v48 = vand.u32 4294901760, %v7268_v5  ;;  %v7282_v11 = vsub.f32 %v11223_v17, %v7281_v55 }
 0x8f8   : > { %9318 = vmatpush1.bf16.msra.mxu0 %v9317_v1  ;;  %v7234_v36 = vand.u32 4294901760, %v7233_v13  ;;  %v7276_v18 = vand.u32 4294901760, %v7275_v22 }
 0x8f9   : > { %9438 = vmatpush1.bf16.msra.mxu1 %v10758_v45  ;;  %9319 = vmatprep.subr.bf16.mxu0 %v11191_v60  ;;  %v7248_v45 = vand.u32 4294901760, %v7247_v47  ;;  %v7262_v31 = vand.u32 4294901760, %v7261_v34  ;;  %v7283_v44 = vand.u32 4294901760, %v7282_v11 }
 0x8fa   : > { %9439 = vmatprep.subr.bf16.mxu1 %v11191_v60  ;;  %v9326_v37 = vpack.c.bf16 %v7241_v4, %v7234_v36 }
 0x8fb   : > { %v9335_v42 = vpack.c.bf16 %v7283_v44, %v7276_v18 }
 0x8fc   : > { %9321 = vmatpush1.bf16.msra.mxu0 %v9320_v26 }
 0x8fd   : > { %9441 = vmatpush1.bf16.msra.mxu1 %v10775_v3  ;;  %9322 = vmatprep.subr.bf16.mxu0 %v11191_v60  ;;  %v9329_v3 = vpack.c.bf16 %v7255_v56, %v7248_v45 }
 0x8fe   : > { %9442 = vmatprep.subr.bf16.mxu1 %v11191_v60 }
 0x900   : > { %9324 = vmatpush1.bf16.msra.mxu0 %v9323_v6 }
 0x901   : > { %9444 = vmatpush1.bf16.msra.mxu1 %v10791_v16  ;;  %9325 = vmatprep.subr.bf16.mxu0 %v11191_v60  ;;  %v9332_v16 = vpack.c.bf16 %v7269_v48, %v7262_v31 }
 0x902   : > { %9445 = vmatprep.subr.bf16.mxu1 %v11191_v60 }
 0x904   : > { %9327 = vmatpush1.bf16.msra.mxu0 %v9326_v37 }
 0x905   : > { %9447 = vmatpush1.bf16.msra.mxu1 %v10803_v61  ;;  %9328 = vmatprep.subr.bf16.mxu0 %v11191_v60 }
 0x906   : > { %9448 = vmatprep.subr.bf16.mxu1 %v11191_v60 }
 0x908   : > { %9330 = vmatpush1.bf16.msra.mxu0 %v9329_v3 }
 0x909   : > { %9450 = vmatpush1.bf16.msra.mxu1 %v10624_v14  ;;  %9331 = vmatprep.subr.bf16.mxu0 %v11191_v60 }
 0x90a   : > { %9451 = vmatprep.subr.bf16.mxu1 %v11191_v60 }
 0x90c   : > { %9333 = vmatpush1.bf16.msra.mxu0 %v9332_v16 }
 0x90d   : > { %9453 = vmatpush1.bf16.msra.mxu1 %v10630_v25  ;;  %9334 = vmatprep.subr.bf16.mxu0 %v11191_v60 }
 0x90e   : > { %9454 = vmatprep.subr.bf16.mxu1 %v11191_v60 }
 0x910   : > { %9336 = vmatpush1.bf16.msra.mxu0 %v9335_v42 }
 0x911   : > { %9456 = vmatpush1.bf16.msra.mxu1 %v10636_v9 }
 0x913   : > { %7312 = vmatmul.mubr.f32.vlgmr.msra.gmra.mrb[16].mxu0 %v10674_v27 }
 0x914   : > { %7810 = vmatmul.mubr.f32.vlgmr.msra.gmra.mrb[10].mxu1 %v10674_v27  ;;  %7317 = vmatprep.mubr.f32.mxu0 %v10676_v2 }
 0x915   : > { %7815 = vmatprep.mubr.f32.mxu1 %v10676_v2 }
 0x917   : > { %7319 = vmatmul.mubr.f32.gmra.mrb[18].mxu0 %v10699_v24 }
 0x918   : > { %7817 = vmatmul.mubr.f32.gmra.mrb[12].mxu1 %v10699_v24  ;;  %7324 = vmatprep.mubr.f32.mxu0 %v10709_v49 }
 0x919   : > { %7822 = vmatprep.mubr.f32.mxu1 %v10709_v49  ;;  %v7946_v49 = vld [vmem:[%s11120_s10] ss:$0 sm:$0xff] }
 0x91b   : > { %7326 = vmatmul.mubr.f32.gmra.mrb[22].mxu0 %v10749_v46 }
 0x91c   : > { %7824 = vmatmul.mubr.f32.gmra.mrb[20].mxu1 %v10749_v46 }
 0x979   : > { %v7458_v60 = vpop.f32.mrb[14].mxu1 }
 0x97a   : > { %v7459_v14 = vpop.f32.mrb[15].mxu1 }
 0x995   : > { %v8892_v25 = vpop.f32.mrb[14].mxu0 }
 0x996   : > { %v6899_v9 = vpop.f32.mrb[15].mxu0  ;;  %v9465_v59 = vadd.f32 %v8892_v25, %v7946_v49 }
 0x997   : > { %v9466_v52 = vadd.f32 %v7946_v49, %v6899_v9 }
 0x99d   : > { %v7575_v27 = vpop.f32.mrb[16].mxu1 }
 0x99e   : > { %v7576_v2 = vpop.f32.mrb[17].mxu1 }
 0x9c5   : > { %v7142_v61 = vpop.f32.mrb[20].mxu0 }
 0x9c6   : > { %v7720_v55 = vpop.f32.mrb[18].mxu1  ;;  %v7143_v17 = vpop.f32.mrb[21].mxu0 }
 0x9c7   : > { %v7721_v24 = vpop.f32.mrb[19].mxu1 }
 0x9e6   : > { %v7313_v46 = vpop.f32.mrb[16].mxu0 }
 0x9e7   : > { %v9467_v62 = vadd.f32 %v7947_v20, %v7313_v46  ;;  %v7811_v57 = vpop.f32.mrb[10].mxu1  ;;  %v7315_v54 = vpop.f32.mrb[17].mxu0 }
 0x9e8   : > { %v7813_v30 = vpop.f32.mrb[11].mxu1 }
 0x9e9   : > { %v9468_v15 = vadd.f32 %v9467_v62, %v7811_v57 }
 0x9ea   : > { %v7320_v28 = vpop.f32.mrb[18].mxu0 }
 0x9eb   : > { %v7828_v21 = vadd.f32 %v9468_v15, %v9466_v52  ;;  %v9469_v53 = vadd.f32 %v7947_v20, %v7320_v28  ;;  %v7818_v43 = vpop.f32.mrb[12].mxu1  ;;  %v7322_v35 = vpop.f32.mrb[19].mxu0 }
 0x9ec   : > { %v7820_v29 = vpop.f32.mrb[13].mxu1 }
 0x9ed   : > { %7830 = vst.msk [vmem:[%s463_s21] sm:$0xff] %vm496_vm0, %v7828_v21  ;;  %v9470_v32 = vadd.f32 %v9469_v53, %v7818_v43 }
 0x9ee   : > { %v7327_v58 = vpop.f32.mrb[22].mxu0 }
 0x9ef   : > { %v7829_v40 = vadd.f32 %v9470_v32, %v9465_v59  ;;  %v7825_v19 = vpop.f32.mrb[20].mxu1  ;;  %v7328_v63 = vpop.f32.mrb[23].mxu0 }
 0x9f0   : > { %v7826_v33 = vpop.f32.mrb[21].mxu1 }
 0x9f1   : > { %7831 = vst.msk [vmem:[%s463_s21 + $0x8] sm:$0xff] %vm496_vm0, %v7829_v40 }
 0x9f2   : > { %9701 = shalt.err (!%p9698_p3)
}
 0x9f3   : > { %s9702_s27 = scalar_lea.hbm %s11063_s15, 256  ;;  %s9706_s23 = scalar_lea.hbm %s11123_s13, 512 }
 0x9f4   : > { %p9703_p4 = scmp.ne.s32.totalorder %s11063_s15, %s9702_s27  ;;  %p9707_p9 = scmp.lt.u32.totalorder %s11063_s15, %s11123_s13 }
 0x9f5   : > { %p9708_p10 = scmp.lt.u32.totalorder %s9706_s23, %s9702_s27  ;;  %p9710_p12 = scmp.lt.u32.totalorder %s9702_s27, %s11063_s15 }
 0x9f6   : > { %p9704_p7 = pnand %p9703_p4, %p9873_p5 }
 0x9f7   : > { %p9709_p11 = por %p9708_p10, %p9707_p9 }
 0x9f8   : > { %p9705_p8 = pneg %p9704_p7 }
 0x9f9   : > { %p9711_p13 = por %p9710_p12, %p9709_p11 }
 0x9fb   : > { %p9712_p0 = pnand %p9711_p13, %p9705_p8 }
 0x9fd   : > { %9715 = shalt.err (!%p9712_p0)
}
 0x9fe   : > { %s9764_s0 = smov 128   ;;  %s11229_s16 = smov 8  }
 0x9ff   : > { %9605 = dma.vmem_to_hbm [thread:$0]  (%p9873_p5), %s11058_s17, 256, %s11063_s15, %s11068_s29, %s9764_s0, %s9764_s0, %s11229_s16  }
 0xa00 PF: > { %p9611_p1 = scmp.ge.s32.totalorder %s9750_s28, 2  ;;  %s7861_s20 = sand.u32 1, %s9738_s25  }
 0xa01   : > { %s7862_s27 = scalar_lea.sflag [#allocation3], %s7861_s20 }
 0xa02   : > { %p9608_p2 = pnand %p9611_p1, %p9877_p6 }
 0xa04   : > { %9733 = dma.done.wait (!%p9608_p2), %s7862_s27, 256  }
 0xa05   : > { %9735 = vsyncadd (!%p9608_p2), %s7862_s27, 4294967040  ;;  %s11230_s21 = sld [smem:[#allocation5_spill]]  ;;  %s11231_s27 = sld [smem:[#allocation6_spill]] }
 0xa06   : > { %p23_p3 = scmp.ge.s32.totalorder %s9860_s14, 4   ;;  %s11232_s25 = smov %s9742_s26 }
 0xa07   : > { %s11234_s28 = smov %s9860_s14 }
 0xa08   :  { %25 = sbr.rel (!%p23_p3) target bundleno = 5 (0x5), region = 113 }
 0xa0b   : > { %s11233_s26 = smov %s11230_s21 }
 0xa0f   :  { %7867 = vsyncpa [#allocation3], 1 }
 0xa10   :  { %7869 = vsyncpa [#allocation3 + $0x1], 1 }

</bundles_post_ra>
